<compile_context>
chip_gen: v5e
topology: v5e:2x2
jax: 0.10.0
libtpu: 0.0.40
codegen_flags: <defaults>
</compile_context>

<pallas_src>
import functools
import math

import jax
import jax.numpy as jnp
from jax import lax
from jax.experimental import pallas as pl
from jax.experimental.pallas import tpu as pltpu


# ----------------------------------------------------------------------------- kernel
def _asn_domain_kernel(feat_ref, adj_ref, ppmi_ref,
                       w1_ref, b1_ref, w2_ref, b2_ref, w3_ref, b3_ref,
                       enc_w_ref, enc_b_ref, self_w_ref, self_b_ref,
                       out_ref):
    """One domain (src or tgt) per grid step: 4 fused 3-layer GCN towers + 3 attentions
    + DiffLoss, everything VMEM-resident, one lane-dense (N, 128) slab written out."""
    f32 = jnp.float32
    bf16 = jnp.bfloat16

    feat = feat_ref[...]          # (N, F)  bf16
    adj = adj_ref[...]            # (N, N)  bf16
    ppmi = ppmi_ref[...]          # (N, N)  bf16
    N = adj.shape[0]
    D = w2_ref.shape[-1]

    def mm(a, b):
        # bf16 MXU matmul with f32 accumulation (elementwise math stays f32).
        return jnp.dot(a.astype(bf16), b.astype(bf16), preferred_element_type=f32)

    # tower order: 0 priv_local(adj, no ReLU), 1 priv_global(ppmi, no ReLU),
    #              2 shared_local(adj, ReLU),  3 shared_global(ppmi, ReLU)
    prop = (adj, ppmi, adj, ppmi)
    use_relu = (False, False, True, True)
    mus, lvs = [], []
    for s in range(4):            # static unroll over the 4 encoder stacks
        a = prop[s]
        h = mm(a, mm(feat, w1_ref[s])) + b1_ref[s]          # gc1 (f32)
        if use_relu[s]:                                      # GCN towers only (static)
            h = jnp.maximum(h, 0.0)
        mus.append(mm(a, mm(h, w2_ref[s])) + b2_ref[s])      # gc2 -> mu
        lvs.append(mm(a, mm(h, w3_ref[s])) + b3_ref[s])      # gc3 -> logvar

    def attend(x1, x2, w, b):
        # Attention over a stack of 2 features: softmax over the pair, weighted sum.
        s1 = jnp.sum(x1 * w, axis=1, keepdims=True) + b
        s2 = jnp.sum(x2 * w, axis=1, keepdims=True) + b
        m = jnp.maximum(s1, s2)
        e1 = jnp.exp(s1 - m)
        e2 = jnp.exp(s2 - m)
        # EUP approximate reciprocal: the two weights sum to ~1.0 (not exactly 1.0);
        # deliberate perf trade vs the PyTorch reference tolerance.
        inv = pl.reciprocal(e1 + e2, approx=True)
        return x1 * (e1 * inv) + x2 * (e2 * inv)

    enc_w = enc_w_ref[...]        # (1, D) f32, encoder attention (shared across domains)
    enc_b = enc_b_ref[...]        # (1, 1)
    sw = self_w_ref[...]          # (1, D) f32, per-domain self attention
    sb = self_b_ref[...]          # (1, 1)

    shared_emb = attend(mus[2], mus[3], enc_w, enc_b)        # encoder output embedding
    z_priv = attend(mus[0], mus[1], sw, sb)                  # self_att([emb_p_l, emb_p_g])
    z_shared = attend(mus[2], mus[3], sw, sb)                # self_att([emb_s_l, emb_s_g])

    # DiffLoss(mu_p_l, mu_s_l) = mean((rownorm(a)^T rownorm(b))^2)
    a = mus[0]
    b = mus[2]
    an = a * pl.reciprocal(jnp.sqrt(jnp.sum(a * a, axis=1, keepdims=True)) + 1e-6,
                           approx=True)
    bn = b * pl.reciprocal(jnp.sqrt(jnp.sum(b * b, axis=1, keepdims=True)) + 1e-6,
                           approx=True)
    c = lax.dot_general(an, bn, (((0,), (0,)), ((), ())),
                        preferred_element_type=f32)          # (D, D)
    dloss = jnp.sum(c * c, keepdims=True) / float(c.shape[0] * c.shape[1])   # (1, 1)

    # Pack everything into one lane-dense slab: 11*D data columns + diff_loss broadcast
    # into the remaining lanes (unmasked full-width store).
    pad_w = out_ref.shape[-1] - 11 * D
    dl_blk = dloss * jnp.ones((N, pad_w), f32)
    out_ref[...] = jnp.concatenate(
        mus + lvs + [shared_emb, z_priv, z_shared, dl_blk], axis=1
    ).astype(out_ref.dtype)


def asn_fused_pallas(feat_all, adj_all, ppmi_all, W1, B1, W2, B2, W3, B3,
                     enc_w, enc_b, self_w, self_b, slab_width=128):
    """Whole ASN encoder (both domains, all towers, attentions, diff-loss) in one call."""
    n_dom, N, F = feat_all.shape
    S, _, H = W1.shape
    D = W2.shape[-1]
    assert 11 * D + 1 <= slab_width

    per_dom = lambda d: (d, 0, 0)
    const = lambda d: (0, 0, 0)      # same block index every step -> Pallas skips re-DMA

    return pl.pallas_call(
        _asn_domain_kernel,
        out_shape=jax.ShapeDtypeStruct((n_dom, N, slab_width), jnp.float32),
        grid=(n_dom,),
        in_specs=[
            pl.BlockSpec((None, N, F), per_dom),   # feat (bf16)
            pl.BlockSpec((None, N, N), per_dom),   # adj  (bf16)  -- no duplication
            pl.BlockSpec((None, N, N), per_dom),   # ppmi (bf16)
            pl.BlockSpec((S, F, H), const),        # W1 (bf16), all 4 stacks
            pl.BlockSpec((S, 1, H), const),        # b1 (f32)
            pl.BlockSpec((S, H, D), const),        # W2 (bf16)
            pl.BlockSpec((S, 1, D), const),        # b2 (f32)
            pl.BlockSpec((S, H, D), const),        # W3 (bf16)
            pl.BlockSpec((S, 1, D), const),        # b3 (f32)
            pl.BlockSpec((None, 1, D), const),     # encoder attention w
            pl.BlockSpec((None, 1, 1), const),     # encoder attention b
            pl.BlockSpec((None, 1, D), per_dom),   # self attention w (src / tgt)
            pl.BlockSpec((None, 1, 1), per_dom),   # self attention b
        ],
        out_specs=pl.BlockSpec((None, N, slab_width), per_dom),
        compiler_params=pltpu.CompilerParams(dimension_semantics=("parallel",)),
    )(feat_all, adj_all, ppmi_all, W1, B1, W2, B2, W3, B3,
      enc_w, enc_b, self_w, self_b)


# ----------------------------------------------------------------------------- loss glue
def cross_entropy(logits, labels):
    logp = jax.nn.log_softmax(logits, axis=-1)
    picked = jnp.take_along_axis(logp, labels[:, None].astype(jnp.int32), axis=1)
    return -jnp.mean(picked)


def bce_with_logits_pos_weight(logits, labels, pos_weight):
    # -[pw*y*log(sigmoid(x)) + (1-y)*log(1-sigmoid(x))], mean reduction
    return jnp.mean(pos_weight * labels * jax.nn.softplus(-logits)
                    + (1.0 - labels) * jax.nn.softplus(logits))


def reconstruction_loss(pred, label, mu, logvar, num_nodes, norm, pos_weight):
    cost = norm * bce_with_logits_pos_weight(pred, label, pos_weight)
    kld = (-0.5 / num_nodes) * jnp.mean(
        jnp.sum(1.0 + 2.0 * logvar - mu ** 2 - jnp.exp(logvar) ** 2, axis=1))
    return cost + kld


# ----------------------------------------------------------------------------- forward
def asn_forward(params, hparams,
                feat_src, adj_src, ppmi_src, feat_tgt, adj_tgt, ppmi_tgt,
                label_src, domain_label, adj_label_src, adj_label_tgt,
                norm_src, norm_tgt, pos_weight_src, pos_weight_tgt,
                train_idx, epoch):
    enc = params["encoder"]
    n_src = feat_src.shape[0]
    n_tgt = feat_tgt.shape[0]
    D = params["clf_W"].shape[0]
    bf16 = jnp.bfloat16

    towers = ("priv_local", "priv_global", "shared_local", "shared_global")
    # domain-batched inputs (bf16 for MXU + half the DMA bytes); no adjacency duplication
    feat_all = jnp.stack([feat_src, feat_tgt]).astype(bf16)
    adj_all = jnp.stack([adj_src, adj_tgt]).astype(bf16)
    ppmi_all = jnp.stack([ppmi_src, ppmi_tgt]).astype(bf16)
    W1 = jnp.stack([enc[t]["gc1"]["W"] for t in towers]).astype(bf16)
    B1 = jnp.stack([enc[t]["gc1"]["b"] for t in towers])[:, None, :]
    W2 = jnp.stack([enc[t]["gc2"]["W"] for t in towers]).astype(bf16)
    B2 = jnp.stack([enc[t]["gc2"]["b"] for t in towers])[:, None, :]
    W3 = jnp.stack([enc[t]["gc3"]["W"] for t in towers]).astype(bf16)
    B3 = jnp.stack([enc[t]["gc3"]["b"] for t in towers])[:, None, :]
    enc_w = enc["att_w"].reshape(1, 1, D)
    enc_b = enc["att_b"].reshape(1, 1, 1)
    self_w = jnp.stack([params["att_src_w"], params["att_tgt_w"]]).reshape(2, 1, D)
    self_b = jnp.stack([params["att_src_b"], params["att_tgt_b"]]).reshape(2, 1, 1)

    # ---- ONE fused pallas_call: towers + attentions + diff loss --------------------
    slab = asn_fused_pallas(feat_all, adj_all, ppmi_all, W1, B1, W2, B2, W3, B3,
                            enc_w, enc_b, self_w, self_b)
    mu_cat = slab[:, :, 0:4 * D]                  # (2, N, 4D): [p_l | p_g | s_l | s_g]
    logvar_cat = slab[:, :, 4 * D:8 * D]          # (2, N, 4D)
    emb_dom = slab[:, :, 8 * D:9 * D]             # (2, N, D) encoder shared embeddings
    z_cat = slab[:, :, 9 * D:11 * D]              # (2, N, 2D): [self_att priv | shared]
    diff_loss = slab[0, 0, 11 * D] + slab[1, 0, 11 * D]

    # ---- tiny heads / decoder / loss reductions: plain XLA (sub-128-lane outputs) ---
    emb = jnp.concatenate([emb_dom[0], emb_dom[1]], axis=0)
    pred_logit = emb @ params["clf_W"] + params["clf_b"]
    # domain discriminator: GRL (identity fwd) -> Linear -> ReLU -> Dropout(eval) -> Linear
    h = jax.nn.relu(emb @ params["dom_W1"] + params["dom_b1"])
    d_logit = h @ params["dom_W2"] + params["dom_b2"]

    clf_loss = cross_entropy(pred_logit[train_idx, :], label_src[train_idx])
    domain_loss = cross_entropy(d_logit, domain_label)

    # inner-product decoder with identity activation: z @ z.T
    recovered_src = z_cat[0] @ z_cat[0].T
    recovered_tgt = z_cat[1] @ z_cat[1].T

    rec_loss = (reconstruction_loss(recovered_src, adj_label_src, mu_cat[0],
                                    logvar_cat[0], n_src, norm_src, pos_weight_src)
                + reconstruction_loss(recovered_tgt, adj_label_tgt, mu_cat[1],
                                      logvar_cat[1], n_tgt, norm_tgt, pos_weight_tgt))

    # NOTE: matches the reference PyTorch exactly — entropy is computed on the FIRST
    # (source) half of the concatenated batch, pred_logit[:n_src].
    target_pred = jax.nn.softmax(pred_logit[:n_src, :], axis=-1)
    target_pred = jnp.clip(target_pred, 1e-9, 1.0)
    entropy_loss = jnp.mean(jnp.sum(-target_pred * jnp.log(target_pred), axis=-1))

    loss = (clf_loss
            + hparams["lmd_d"] * domain_loss
            + hparams["lmd_r"] * rec_loss
            + hparams["lmd_f"] * diff_loss
            + entropy_loss * (epoch / hparams["epochs"] * 0.01))
    return pred_logit, loss


# ----------------------------------------------------------------------------- param init
def init_graph_conv(key, in_dim, out_dim):
    std = 1.0 / math.sqrt(out_dim)
    k1, k2 = jax.random.split(key)
    return {
        "W": jax.random.uniform(k1, (in_dim, out_dim), jnp.float32, -std, std),
        "b": jax.random.uniform(k2, (out_dim,), jnp.float32, -std, std),
    }


def init_gcn_stack(key, in_dim, hid_dim, out_dim):
    k1, k2, k3 = jax.random.split(key, 3)
    return {
        "gc1": init_graph_conv(k1, in_dim, hid_dim),
        "gc2": init_graph_conv(k2, hid_dim, out_dim),
        "gc3": init_graph_conv(k3, hid_dim, out_dim),
    }


def init_linear(key, in_dim, out_dim):
    bound = 1.0 / math.sqrt(in_dim)
    k1, k2 = jax.random.split(key)
    W = jax.random.uniform(k1, (in_dim, out_dim), jnp.float32, -bound, bound)
    b = jax.random.uniform(k2, (out_dim,), jnp.float32, -bound, bound)
    return W, b


def init_attention(key, dim):
    bound = 1.0 / math.sqrt(dim)
    k1, k2 = jax.random.split(key)
    w = jax.random.uniform(k1, (dim,), jnp.float32, -bound, bound)
    b = jax.random.uniform(k2, (), jnp.float32, -bound, bound)
    return w, b


def init_asn_params(key, input_dim, hid_dim, output_dim, num_class):
    keys = jax.random.split(key, 10)
    att_w, att_b = init_attention(keys[4], output_dim)
    clf_W, clf_b = init_linear(keys[5], output_dim, num_class)
    dom_W1, dom_b1 = init_linear(keys[6], output_dim, 10)
    dom_W2, dom_b2 = init_linear(keys[7], 10, 2)
    att_src_w, att_src_b = init_attention(keys[8], output_dim)
    att_tgt_w, att_tgt_b = init_attention(keys[9], output_dim)
    return {
        "encoder": {
            "priv_local": init_gcn_stack(keys[0], input_dim, hid_dim, output_dim),
            "priv_global": init_gcn_stack(keys[1], input_dim, hid_dim, output_dim),
            "shared_local": init_gcn_stack(keys[2], input_dim, hid_dim, output_dim),
            "shared_global": init_gcn_stack(keys[3], input_dim, hid_dim, output_dim),
            "att_w": att_w, "att_b": att_b,
        },
        "clf_W": clf_W, "clf_b": clf_b,
        "dom_W1": dom_W1, "dom_b1": dom_b1,
        "dom_W2": dom_W2, "dom_b2": dom_b2,
        "att_src_w": att_src_w, "att_src_b": att_src_b,
        "att_tgt_w": att_tgt_w, "att_tgt_b": att_tgt_b,
    }


# ----------------------------------------------------------------------------- main
if __name__ == "__main__":
    # small, TPU-friendly shapes
    N = 16            # nodes per domain
    INPUT_DIM = 32
    HID_DIM = 16
    OUTPUT_DIM = 8
    NUM_CLASS = 4

    hparams = {"lmd_d": 0.5, "lmd_r": 1.0, "lmd_f": 1e-4, "epochs": 100}
    epoch = 5

    key = jax.random.PRNGKey(0)
    kp, kd = jax.random.split(key)
    params = init_asn_params(kp, INPUT_DIM, HID_DIM, OUTPUT_DIM, NUM_CLASS)

    ks = jax.random.split(kd, 10)
    feat_src = jax.random.normal(ks[0], (N, INPUT_DIM), jnp.float32)
    feat_tgt = jax.random.normal(ks[1], (N, INPUT_DIM), jnp.float32)
    adj_src = jax.random.uniform(ks[2], (N, N), jnp.float32) / N
    adj_tgt = jax.random.uniform(ks[3], (N, N), jnp.float32) / N
    ppmi_src = jax.random.uniform(ks[4], (N, N), jnp.float32) / N
    ppmi_tgt = jax.random.uniform(ks[5], (N, N), jnp.float32) / N
    label_src = jax.random.randint(ks[6], (N,), 0, NUM_CLASS, jnp.int32)
    domain_label = jnp.concatenate(
        [jnp.zeros((N,), jnp.int32), jnp.ones((N,), jnp.int32)], axis=0)
    adj_label_src = (jax.random.uniform(ks[7], (N, N)) > 0.5).astype(jnp.float32)
    adj_label_tgt = (jax.random.uniform(ks[8], (N, N)) > 0.5).astype(jnp.float32)
    norm_src = jnp.float32(0.7)
    norm_tgt = jnp.float32(0.65)
    pos_weight_src = jnp.float32(1.5)
    pos_weight_tgt = jnp.float32(1.3)
    train_idx = jnp.arange(8, dtype=jnp.int32)

    fwd = jax.jit(functools.partial(asn_forward, params, hparams))
    pred_logit, loss = fwd(feat_src, adj_src, ppmi_src, feat_tgt, adj_tgt, ppmi_tgt,
                           label_src, domain_label, adj_label_src, adj_label_tgt,
                           norm_src, norm_tgt, pos_weight_src, pos_weight_tgt,
                           train_idx, epoch)
    jax.block_until_ready((pred_logit, loss))

    assert pred_logit.shape == (2 * N, NUM_CLASS)
    assert loss.shape == ()
    assert bool(jnp.isfinite(loss))
    print("KERNEL_OK")
</pallas_src>

<mosaic_0001>
module attributes {stable_mosaic.version = 11 : i64} {
  func.func @_asn_domain_kernel(%arg0: i32, %arg1: memref<1x16x32xbf16, #tpu.memory_space<vmem>>, %arg2: memref<1x16x16xbf16, #tpu.memory_space<vmem>>, %arg3: memref<1x16x16xbf16, #tpu.memory_space<vmem>>, %arg4: memref<4x32x16xbf16, #tpu.memory_space<vmem>>, %arg5: memref<4x1x16xf32, #tpu.memory_space<vmem>>, %arg6: memref<4x16x8xbf16, #tpu.memory_space<vmem>>, %arg7: memref<4x1x8xf32, #tpu.memory_space<vmem>>, %arg8: memref<4x16x8xbf16, #tpu.memory_space<vmem>>, %arg9: memref<4x1x8xf32, #tpu.memory_space<vmem>>, %arg10: memref<1x1x8xf32, #tpu.memory_space<vmem>>, %arg11: memref<1x1x1xf32, #tpu.memory_space<vmem>>, %arg12: memref<1x1x8xf32, #tpu.memory_space<vmem>>, %arg13: memref<1x1x1xf32, #tpu.memory_space<vmem>>, %arg14: memref<1x16x128xf32, #tpu.memory_space<vmem>>) attributes {dimension_semantics = [#tpu.dimension_semantics<parallel>], iteration_bounds = array<i64: 2>, scalar_prefetch = 0 : i64, scratch_operands = 0 : i64, tpu.core_type = #tpu.core_type<tc>, window_params = [{transform_indices = @transform_0, window_bounds = array<i64: 1, 16, 32>}, {transform_indices = @transform_1, window_bounds = array<i64: 1, 16, 16>}, {transform_indices = @transform_2, window_bounds = array<i64: 1, 16, 16>}, {pipeline_mode = #tpu.pipeline_mode<synchronous>, transform_indices = @transform_3, window_bounds = array<i64: 4, 32, 16>}, {pipeline_mode = #tpu.pipeline_mode<synchronous>, transform_indices = @transform_4, window_bounds = array<i64: 4, 1, 16>}, {pipeline_mode = #tpu.pipeline_mode<synchronous>, transform_indices = @transform_5, window_bounds = array<i64: 4, 16, 8>}, {pipeline_mode = #tpu.pipeline_mode<synchronous>, transform_indices = @transform_6, window_bounds = array<i64: 4, 1, 8>}, {pipeline_mode = #tpu.pipeline_mode<synchronous>, transform_indices = @transform_7, window_bounds = array<i64: 4, 16, 8>}, {pipeline_mode = #tpu.pipeline_mode<synchronous>, transform_indices = @transform_8, window_bounds = array<i64: 4, 1, 8>}, {pipeline_mode = #tpu.pipeline_mode<synchronous>, transform_indices = @transform_9, window_bounds = array<i64: 1, 1, 8>}, {pipeline_mode = #tpu.pipeline_mode<synchronous>, transform_indices = @transform_10, window_bounds = array<i64: 1, 1, 1>}, {transform_indices = @transform_11, window_bounds = array<i64: 1, 1, 8>}, {transform_indices = @transform_12, window_bounds = array<i64: 1, 1, 1>}, {transform_indices = @transform_13, window_bounds = array<i64: 1, 16, 128>}]} {
    %c0 = arith.constant 0 : index
    %c0_0 = arith.constant 0 : index
    %c0_1 = arith.constant 0 : index
    %0 = vector.load %arg1[%c0, %c0_0, %c0_1] : memref<1x16x32xbf16, #tpu.memory_space<vmem>>, vector<1x16x32xbf16>
    %1 = vector.shape_cast %0 : vector<1x16x32xbf16> to vector<16x32xbf16>
    %c0_2 = arith.constant 0 : index
    %c0_3 = arith.constant 0 : index
    %c0_4 = arith.constant 0 : index
    %2 = vector.load %arg2[%c0_2, %c0_3, %c0_4] : memref<1x16x16xbf16, #tpu.memory_space<vmem>>, vector<1x16x16xbf16>
    %3 = vector.shape_cast %2 : vector<1x16x16xbf16> to vector<16x16xbf16>
    %c0_5 = arith.constant 0 : index
    %c0_6 = arith.constant 0 : index
    %c0_7 = arith.constant 0 : index
    %4 = vector.load %arg3[%c0_5, %c0_6, %c0_7] : memref<1x16x16xbf16, #tpu.memory_space<vmem>>, vector<1x16x16xbf16>
    %5 = vector.shape_cast %4 : vector<1x16x16xbf16> to vector<16x16xbf16>
    %c0_8 = arith.constant 0 : index
    %c0_9 = arith.constant 0 : index
    %c0_10 = arith.constant 0 : index
    %6 = vector.load %arg4[%c0_8, %c0_9, %c0_10] : memref<4x32x16xbf16, #tpu.memory_space<vmem>>, vector<1x32x16xbf16>
    %7 = vector.shape_cast %6 : vector<1x32x16xbf16> to vector<32x16xbf16>
    %cst = arith.constant dense<0.000000e+00> : vector<16x16xf32>
    %8 = tpu.matmul %1, %7, %cst {dimension_numbers = #tpu.dot_dimension_numbers<[1], [0], [0], [1], [0, 0, 1, 1], [], []>} : vector<16x32xbf16>, vector<32x16xbf16>, vector<16x16xf32> -> vector<16x16xf32>
    %9 = arith.truncf %8 : vector<16x16xf32> to vector<16x16xbf16>
    %cst_11 = arith.constant dense<0.000000e+00> : vector<16x16xf32>
    %10 = tpu.matmul %3, %9, %cst_11 {dimension_numbers = #tpu.dot_dimension_numbers<[1], [0], [0], [1], [0, 0, 1, 1], [], []>} : vector<16x16xbf16>, vector<16x16xbf16>, vector<16x16xf32> -> vector<16x16xf32>
    %c0_12 = arith.constant 0 : index
    %c0_13 = arith.constant 0 : index
    %c0_14 = arith.constant 0 : index
    %11 = vector.load %arg5[%c0_12, %c0_13, %c0_14] : memref<4x1x16xf32, #tpu.memory_space<vmem>>, vector<1x1x16xf32>
    %12 = vector.shape_cast %11 : vector<1x1x16xf32> to vector<1x16xf32>
    %13 = vector.broadcast %12 : vector<1x16xf32> to vector<16x16xf32>
    %14 = arith.addf %10, %13 : vector<16x16xf32>
    %c0_15 = arith.constant 0 : index
    %c0_16 = arith.constant 0 : index
    %c0_17 = arith.constant 0 : index
    %15 = vector.load %arg6[%c0_15, %c0_16, %c0_17] : memref<4x16x8xbf16, #tpu.memory_space<vmem>>, vector<1x16x8xbf16>
    %16 = vector.shape_cast %15 : vector<1x16x8xbf16> to vector<16x8xbf16>
    %17 = arith.truncf %14 : vector<16x16xf32> to vector<16x16xbf16>
    %cst_18 = arith.constant dense<0.000000e+00> : vector<16x8xf32>
    %18 = tpu.matmul %17, %16, %cst_18 {dimension_numbers = #tpu.dot_dimension_numbers<[1], [0], [0], [1], [0, 0, 1, 1], [], []>} : vector<16x16xbf16>, vector<16x8xbf16>, vector<16x8xf32> -> vector<16x8xf32>
    %19 = arith.truncf %18 : vector<16x8xf32> to vector<16x8xbf16>
    %cst_19 = arith.constant dense<0.000000e+00> : vector<16x8xf32>
    %20 = tpu.matmul %3, %19, %cst_19 {dimension_numbers = #tpu.dot_dimension_numbers<[1], [0], [0], [1], [0, 0, 1, 1], [], []>} : vector<16x16xbf16>, vector<16x8xbf16>, vector<16x8xf32> -> vector<16x8xf32>
    %c0_20 = arith.constant 0 : index
    %c0_21 = arith.constant 0 : index
    %c0_22 = arith.constant 0 : index
    %21 = vector.load %arg7[%c0_20, %c0_21, %c0_22] : memref<4x1x8xf32, #tpu.memory_space<vmem>>, vector<1x1x8xf32>
    %22 = vector.shape_cast %21 : vector<1x1x8xf32> to vector<1x8xf32>
    %23 = vector.broadcast %22 : vector<1x8xf32> to vector<16x8xf32>
    %24 = arith.addf %20, %23 : vector<16x8xf32>
    %c0_23 = arith.constant 0 : index
    %c0_24 = arith.constant 0 : index
    %c0_25 = arith.constant 0 : index
    %25 = vector.load %arg8[%c0_23, %c0_24, %c0_25] : memref<4x16x8xbf16, #tpu.memory_space<vmem>>, vector<1x16x8xbf16>
    %26 = vector.shape_cast %25 : vector<1x16x8xbf16> to vector<16x8xbf16>
    %27 = arith.truncf %14 : vector<16x16xf32> to vector<16x16xbf16>
    %cst_26 = arith.constant dense<0.000000e+00> : vector<16x8xf32>
    %28 = tpu.matmul %27, %26, %cst_26 {dimension_numbers = #tpu.dot_dimension_numbers<[1], [0], [0], [1], [0, 0, 1, 1], [], []>} : vector<16x16xbf16>, vector<16x8xbf16>, vector<16x8xf32> -> vector<16x8xf32>
    %29 = arith.truncf %28 : vector<16x8xf32> to vector<16x8xbf16>
    %cst_27 = arith.constant dense<0.000000e+00> : vector<16x8xf32>
    %30 = tpu.matmul %3, %29, %cst_27 {dimension_numbers = #tpu.dot_dimension_numbers<[1], [0], [0], [1], [0, 0, 1, 1], [], []>} : vector<16x16xbf16>, vector<16x8xbf16>, vector<16x8xf32> -> vector<16x8xf32>
    %c0_28 = arith.constant 0 : index
    %c0_29 = arith.constant 0 : index
    %c0_30 = arith.constant 0 : index
    %31 = vector.load %arg9[%c0_28, %c0_29, %c0_30] : memref<4x1x8xf32, #tpu.memory_space<vmem>>, vector<1x1x8xf32>
    %32 = vector.shape_cast %31 : vector<1x1x8xf32> to vector<1x8xf32>
    %33 = vector.broadcast %32 : vector<1x8xf32> to vector<16x8xf32>
    %34 = arith.addf %30, %33 : vector<16x8xf32>
    %c1 = arith.constant 1 : index
    %c0_31 = arith.constant 0 : index
    %c0_32 = arith.constant 0 : index
    %35 = vector.load %arg4[%c1, %c0_31, %c0_32] : memref<4x32x16xbf16, #tpu.memory_space<vmem>>, vector<1x32x16xbf16>
    %36 = vector.shape_cast %35 : vector<1x32x16xbf16> to vector<32x16xbf16>
    %cst_33 = arith.constant dense<0.000000e+00> : vector<16x16xf32>
    %37 = tpu.matmul %1, %36, %cst_33 {dimension_numbers = #tpu.dot_dimension_numbers<[1], [0], [0], [1], [0, 0, 1, 1], [], []>} : vector<16x32xbf16>, vector<32x16xbf16>, vector<16x16xf32> -> vector<16x16xf32>
    %38 = arith.truncf %37 : vector<16x16xf32> to vector<16x16xbf16>
    %cst_34 = arith.constant dense<0.000000e+00> : vector<16x16xf32>
    %39 = tpu.matmul %5, %38, %cst_34 {dimension_numbers = #tpu.dot_dimension_numbers<[1], [0], [0], [1], [0, 0, 1, 1], [], []>} : vector<16x16xbf16>, vector<16x16xbf16>, vector<16x16xf32> -> vector<16x16xf32>
    %c1_35 = arith.constant 1 : index
    %c0_36 = arith.constant 0 : index
    %c0_37 = arith.constant 0 : index
    %40 = vector.load %arg5[%c1_35, %c0_36, %c0_37] : memref<4x1x16xf32, #tpu.memory_space<vmem>>, vector<1x1x16xf32>
    %41 = vector.shape_cast %40 : vector<1x1x16xf32> to vector<1x16xf32>
    %42 = vector.broadcast %41 : vector<1x16xf32> to vector<16x16xf32>
    %43 = arith.addf %39, %42 : vector<16x16xf32>
    %c1_38 = arith.constant 1 : index
    %c0_39 = arith.constant 0 : index
    %c0_40 = arith.constant 0 : index
    %44 = vector.load %arg6[%c1_38, %c0_39, %c0_40] : memref<4x16x8xbf16, #tpu.memory_space<vmem>>, vector<1x16x8xbf16>
    %45 = vector.shape_cast %44 : vector<1x16x8xbf16> to vector<16x8xbf16>
    %46 = arith.truncf %43 : vector<16x16xf32> to vector<16x16xbf16>
    %cst_41 = arith.constant dense<0.000000e+00> : vector<16x8xf32>
    %47 = tpu.matmul %46, %45, %cst_41 {dimension_numbers = #tpu.dot_dimension_numbers<[1], [0], [0], [1], [0, 0, 1, 1], [], []>} : vector<16x16xbf16>, vector<16x8xbf16>, vector<16x8xf32> -> vector<16x8xf32>
    %48 = arith.truncf %47 : vector<16x8xf32> to vector<16x8xbf16>
    %cst_42 = arith.constant dense<0.000000e+00> : vector<16x8xf32>
    %49 = tpu.matmul %5, %48, %cst_42 {dimension_numbers = #tpu.dot_dimension_numbers<[1], [0], [0], [1], [0, 0, 1, 1], [], []>} : vector<16x16xbf16>, vector<16x8xbf16>, vector<16x8xf32> -> vector<16x8xf32>
    %c1_43 = arith.constant 1 : index
    %c0_44 = arith.constant 0 : index
    %c0_45 = arith.constant 0 : index
    %50 = vector.load %arg7[%c1_43, %c0_44, %c0_45] : memref<4x1x8xf32, #tpu.memory_space<vmem>>, vector<1x1x8xf32>
    %51 = vector.shape_cast %50 : vector<1x1x8xf32> to vector<1x8xf32>
    %52 = vector.broadcast %51 : vector<1x8xf32> to vector<16x8xf32>
    %53 = arith.addf %49, %52 : vector<16x8xf32>
    %c1_46 = arith.constant 1 : index
    %c0_47 = arith.constant 0 : index
    %c0_48 = arith.constant 0 : index
    %54 = vector.load %arg8[%c1_46, %c0_47, %c0_48] : memref<4x16x8xbf16, #tpu.memory_space<vmem>>, vector<1x16x8xbf16>
    %55 = vector.shape_cast %54 : vector<1x16x8xbf16> to vector<16x8xbf16>
    %56 = arith.truncf %43 : vector<16x16xf32> to vector<16x16xbf16>
    %cst_49 = arith.constant dense<0.000000e+00> : vector<16x8xf32>
    %57 = tpu.matmul %56, %55, %cst_49 {dimension_numbers = #tpu.dot_dimension_numbers<[1], [0], [0], [1], [0, 0, 1, 1], [], []>} : vector<16x16xbf16>, vector<16x8xbf16>, vector<16x8xf32> -> vector<16x8xf32>
    %58 = arith.truncf %57 : vector<16x8xf32> to vector<16x8xbf16>
    %cst_50 = arith.constant dense<0.000000e+00> : vector<16x8xf32>
    %59 = tpu.matmul %5, %58, %cst_50 {dimension_numbers = #tpu.dot_dimension_numbers<[1], [0], [0], [1], [0, 0, 1, 1], [], []>} : vector<16x16xbf16>, vector<16x8xbf16>, vector<16x8xf32> -> vector<16x8xf32>
    %c1_51 = arith.constant 1 : index
    %c0_52 = arith.constant 0 : index
    %c0_53 = arith.constant 0 : index
    %60 = vector.load %arg9[%c1_51, %c0_52, %c0_53] : memref<4x1x8xf32, #tpu.memory_space<vmem>>, vector<1x1x8xf32>
    %61 = vector.shape_cast %60 : vector<1x1x8xf32> to vector<1x8xf32>
    %62 = vector.broadcast %61 : vector<1x8xf32> to vector<16x8xf32>
    %63 = arith.addf %59, %62 : vector<16x8xf32>
    %c2 = arith.constant 2 : index
    %c0_54 = arith.constant 0 : index
    %c0_55 = arith.constant 0 : index
    %64 = vector.load %arg4[%c2, %c0_54, %c0_55] : memref<4x32x16xbf16, #tpu.memory_space<vmem>>, vector<1x32x16xbf16>
    %65 = vector.shape_cast %64 : vector<1x32x16xbf16> to vector<32x16xbf16>
    %cst_56 = arith.constant dense<0.000000e+00> : vector<16x16xf32>
    %66 = tpu.matmul %1, %65, %cst_56 {dimension_numbers = #tpu.dot_dimension_numbers<[1], [0], [0], [1], [0, 0, 1, 1], [], []>} : vector<16x32xbf16>, vector<32x16xbf16>, vector<16x16xf32> -> vector<16x16xf32>
    %67 = arith.truncf %66 : vector<16x16xf32> to vector<16x16xbf16>
    %cst_57 = arith.constant dense<0.000000e+00> : vector<16x16xf32>
    %68 = tpu.matmul %3, %67, %cst_57 {dimension_numbers = #tpu.dot_dimension_numbers<[1], [0], [0], [1], [0, 0, 1, 1], [], []>} : vector<16x16xbf16>, vector<16x16xbf16>, vector<16x16xf32> -> vector<16x16xf32>
    %c2_58 = arith.constant 2 : index
    %c0_59 = arith.constant 0 : index
    %c0_60 = arith.constant 0 : index
    %69 = vector.load %arg5[%c2_58, %c0_59, %c0_60] : memref<4x1x16xf32, #tpu.memory_space<vmem>>, vector<1x1x16xf32>
    %70 = vector.shape_cast %69 : vector<1x1x16xf32> to vector<1x16xf32>
    %71 = vector.broadcast %70 : vector<1x16xf32> to vector<16x16xf32>
    %72 = arith.addf %68, %71 : vector<16x16xf32>
    %cst_61 = arith.constant 0.000000e+00 : f32
    %73 = vector.broadcast %cst_61 : f32 to vector<16x16xf32>
    %74 = arith.maximumf %72, %73 : vector<16x16xf32>
    %c2_62 = arith.constant 2 : index
    %c0_63 = arith.constant 0 : index
    %c0_64 = arith.constant 0 : index
    %75 = vector.load %arg6[%c2_62, %c0_63, %c0_64] : memref<4x16x8xbf16, #tpu.memory_space<vmem>>, vector<1x16x8xbf16>
    %76 = vector.shape_cast %75 : vector<1x16x8xbf16> to vector<16x8xbf16>
    %77 = arith.truncf %74 : vector<16x16xf32> to vector<16x16xbf16>
    %cst_65 = arith.constant dense<0.000000e+00> : vector<16x8xf32>
    %78 = tpu.matmul %77, %76, %cst_65 {dimension_numbers = #tpu.dot_dimension_numbers<[1], [0], [0], [1], [0, 0, 1, 1], [], []>} : vector<16x16xbf16>, vector<16x8xbf16>, vector<16x8xf32> -> vector<16x8xf32>
    %79 = arith.truncf %78 : vector<16x8xf32> to vector<16x8xbf16>
    %cst_66 = arith.constant dense<0.000000e+00> : vector<16x8xf32>
    %80 = tpu.matmul %3, %79, %cst_66 {dimension_numbers = #tpu.dot_dimension_numbers<[1], [0], [0], [1], [0, 0, 1, 1], [], []>} : vector<16x16xbf16>, vector<16x8xbf16>, vector<16x8xf32> -> vector<16x8xf32>
    %c2_67 = arith.constant 2 : index
    %c0_68 = arith.constant 0 : index
    %c0_69 = arith.constant 0 : index
    %81 = vector.load %arg7[%c2_67, %c0_68, %c0_69] : memref<4x1x8xf32, #tpu.memory_space<vmem>>, vector<1x1x8xf32>
    %82 = vector.shape_cast %81 : vector<1x1x8xf32> to vector<1x8xf32>
    %83 = vector.broadcast %82 : vector<1x8xf32> to vector<16x8xf32>
    %84 = arith.addf %80, %83 : vector<16x8xf32>
    %c2_70 = arith.constant 2 : index
    %c0_71 = arith.constant 0 : index
    %c0_72 = arith.constant 0 : index
    %85 = vector.load %arg8[%c2_70, %c0_71, %c0_72] : memref<4x16x8xbf16, #tpu.memory_space<vmem>>, vector<1x16x8xbf16>
    %86 = vector.shape_cast %85 : vector<1x16x8xbf16> to vector<16x8xbf16>
    %87 = arith.truncf %74 : vector<16x16xf32> to vector<16x16xbf16>
    %cst_73 = arith.constant dense<0.000000e+00> : vector<16x8xf32>
    %88 = tpu.matmul %87, %86, %cst_73 {dimension_numbers = #tpu.dot_dimension_numbers<[1], [0], [0], [1], [0, 0, 1, 1], [], []>} : vector<16x16xbf16>, vector<16x8xbf16>, vector<16x8xf32> -> vector<16x8xf32>
    %89 = arith.truncf %88 : vector<16x8xf32> to vector<16x8xbf16>
    %cst_74 = arith.constant dense<0.000000e+00> : vector<16x8xf32>
    %90 = tpu.matmul %3, %89, %cst_74 {dimension_numbers = #tpu.dot_dimension_numbers<[1], [0], [0], [1], [0, 0, 1, 1], [], []>} : vector<16x16xbf16>, vector<16x8xbf16>, vector<16x8xf32> -> vector<16x8xf32>
    %c2_75 = arith.constant 2 : index
    %c0_76 = arith.constant 0 : index
    %c0_77 = arith.constant 0 : index
    %91 = vector.load %arg9[%c2_75, %c0_76, %c0_77] : memref<4x1x8xf32, #tpu.memory_space<vmem>>, vector<1x1x8xf32>
    %92 = vector.shape_cast %91 : vector<1x1x8xf32> to vector<1x8xf32>
    %93 = vector.broadcast %92 : vector<1x8xf32> to vector<16x8xf32>
    %94 = arith.addf %90, %93 : vector<16x8xf32>
    %c3 = arith.constant 3 : index
    %c0_78 = arith.constant 0 : index
    %c0_79 = arith.constant 0 : index
    %95 = vector.load %arg4[%c3, %c0_78, %c0_79] : memref<4x32x16xbf16, #tpu.memory_space<vmem>>, vector<1x32x16xbf16>
    %96 = vector.shape_cast %95 : vector<1x32x16xbf16> to vector<32x16xbf16>
    %cst_80 = arith.constant dense<0.000000e+00> : vector<16x16xf32>
    %97 = tpu.matmul %1, %96, %cst_80 {dimension_numbers = #tpu.dot_dimension_numbers<[1], [0], [0], [1], [0, 0, 1, 1], [], []>} : vector<16x32xbf16>, vector<32x16xbf16>, vector<16x16xf32> -> vector<16x16xf32>
    %98 = arith.truncf %97 : vector<16x16xf32> to vector<16x16xbf16>
    %cst_81 = arith.constant dense<0.000000e+00> : vector<16x16xf32>
    %99 = tpu.matmul %5, %98, %cst_81 {dimension_numbers = #tpu.dot_dimension_numbers<[1], [0], [0], [1], [0, 0, 1, 1], [], []>} : vector<16x16xbf16>, vector<16x16xbf16>, vector<16x16xf32> -> vector<16x16xf32>
    %c3_82 = arith.constant 3 : index
    %c0_83 = arith.constant 0 : index
    %c0_84 = arith.constant 0 : index
    %100 = vector.load %arg5[%c3_82, %c0_83, %c0_84] : memref<4x1x16xf32, #tpu.memory_space<vmem>>, vector<1x1x16xf32>
    %101 = vector.shape_cast %100 : vector<1x1x16xf32> to vector<1x16xf32>
    %102 = vector.broadcast %101 : vector<1x16xf32> to vector<16x16xf32>
    %103 = arith.addf %99, %102 : vector<16x16xf32>
    %cst_85 = arith.constant 0.000000e+00 : f32
    %104 = vector.broadcast %cst_85 : f32 to vector<16x16xf32>
    %105 = arith.maximumf %103, %104 : vector<16x16xf32>
    %c3_86 = arith.constant 3 : index
    %c0_87 = arith.constant 0 : index
    %c0_88 = arith.constant 0 : index
    %106 = vector.load %arg6[%c3_86, %c0_87, %c0_88] : memref<4x16x8xbf16, #tpu.memory_space<vmem>>, vector<1x16x8xbf16>
    %107 = vector.shape_cast %106 : vector<1x16x8xbf16> to vector<16x8xbf16>
    %108 = arith.truncf %105 : vector<16x16xf32> to vector<16x16xbf16>
    %cst_89 = arith.constant dense<0.000000e+00> : vector<16x8xf32>
    %109 = tpu.matmul %108, %107, %cst_89 {dimension_numbers = #tpu.dot_dimension_numbers<[1], [0], [0], [1], [0, 0, 1, 1], [], []>} : vector<16x16xbf16>, vector<16x8xbf16>, vector<16x8xf32> -> vector<16x8xf32>
    %110 = arith.truncf %109 : vector<16x8xf32> to vector<16x8xbf16>
    %cst_90 = arith.constant dense<0.000000e+00> : vector<16x8xf32>
    %111 = tpu.matmul %5, %110, %cst_90 {dimension_numbers = #tpu.dot_dimension_numbers<[1], [0], [0], [1], [0, 0, 1, 1], [], []>} : vector<16x16xbf16>, vector<16x8xbf16>, vector<16x8xf32> -> vector<16x8xf32>
    %c3_91 = arith.constant 3 : index
    %c0_92 = arith.constant 0 : index
    %c0_93 = arith.constant 0 : index
    %112 = vector.load %arg7[%c3_91, %c0_92, %c0_93] : memref<4x1x8xf32, #tpu.memory_space<vmem>>, vector<1x1x8xf32>
    %113 = vector.shape_cast %112 : vector<1x1x8xf32> to vector<1x8xf32>
    %114 = vector.broadcast %113 : vector<1x8xf32> to vector<16x8xf32>
    %115 = arith.addf %111, %114 : vector<16x8xf32>
    %c3_94 = arith.constant 3 : index
    %c0_95 = arith.constant 0 : index
    %c0_96 = arith.constant 0 : index
    %116 = vector.load %arg8[%c3_94, %c0_95, %c0_96] : memref<4x16x8xbf16, #tpu.memory_space<vmem>>, vector<1x16x8xbf16>
    %117 = vector.shape_cast %116 : vector<1x16x8xbf16> to vector<16x8xbf16>
    %118 = arith.truncf %105 : vector<16x16xf32> to vector<16x16xbf16>
    %cst_97 = arith.constant dense<0.000000e+00> : vector<16x8xf32>
    %119 = tpu.matmul %118, %117, %cst_97 {dimension_numbers = #tpu.dot_dimension_numbers<[1], [0], [0], [1], [0, 0, 1, 1], [], []>} : vector<16x16xbf16>, vector<16x8xbf16>, vector<16x8xf32> -> vector<16x8xf32>
    %120 = arith.truncf %119 : vector<16x8xf32> to vector<16x8xbf16>
    %cst_98 = arith.constant dense<0.000000e+00> : vector<16x8xf32>
    %121 = tpu.matmul %5, %120, %cst_98 {dimension_numbers = #tpu.dot_dimension_numbers<[1], [0], [0], [1], [0, 0, 1, 1], [], []>} : vector<16x16xbf16>, vector<16x8xbf16>, vector<16x8xf32> -> vector<16x8xf32>
    %c3_99 = arith.constant 3 : index
    %c0_100 = arith.constant 0 : index
    %c0_101 = arith.constant 0 : index
    %122 = vector.load %arg9[%c3_99, %c0_100, %c0_101] : memref<4x1x8xf32, #tpu.memory_space<vmem>>, vector<1x1x8xf32>
    %123 = vector.shape_cast %122 : vector<1x1x8xf32> to vector<1x8xf32>
    %124 = vector.broadcast %123 : vector<1x8xf32> to vector<16x8xf32>
    %125 = arith.addf %121, %124 : vector<16x8xf32>
    %c0_102 = arith.constant 0 : index
    %c0_103 = arith.constant 0 : index
    %c0_104 = arith.constant 0 : index
    %126 = vector.load %arg10[%c0_102, %c0_103, %c0_104] : memref<1x1x8xf32, #tpu.memory_space<vmem>>, vector<1x1x8xf32>
    %127 = vector.shape_cast %126 : vector<1x1x8xf32> to vector<1x8xf32>
    %c0_105 = arith.constant 0 : index
    %c0_106 = arith.constant 0 : index
    %c0_107 = arith.constant 0 : index
    %128 = vector.load %arg11[%c0_105, %c0_106, %c0_107] : memref<1x1x1xf32, #tpu.memory_space<vmem>>, vector<1x1x1xf32>
    %129 = vector.shape_cast %128 : vector<1x1x1xf32> to vector<1x1xf32>
    %c0_108 = arith.constant 0 : index
    %c0_109 = arith.constant 0 : index
    %c0_110 = arith.constant 0 : index
    %130 = vector.load %arg12[%c0_108, %c0_109, %c0_110] : memref<1x1x8xf32, #tpu.memory_space<vmem>>, vector<1x1x8xf32>
    %131 = vector.shape_cast %130 : vector<1x1x8xf32> to vector<1x8xf32>
    %c0_111 = arith.constant 0 : index
    %c0_112 = arith.constant 0 : index
    %c0_113 = arith.constant 0 : index
    %132 = vector.load %arg13[%c0_111, %c0_112, %c0_113] : memref<1x1x1xf32, #tpu.memory_space<vmem>>, vector<1x1x1xf32>
    %133 = vector.shape_cast %132 : vector<1x1x1xf32> to vector<1x1xf32>
    %134 = vector.broadcast %127 : vector<1x8xf32> to vector<16x8xf32>
    %135 = arith.mulf %84, %134 : vector<16x8xf32>
    %cst_114 = arith.constant dense<0.000000e+00> : vector<16xf32>
    %136 = vector.multi_reduction <add>, %135, %cst_114 [1] : vector<16x8xf32> to vector<16xf32>
    %137 = vector.shape_cast %136 : vector<16xf32> to vector<16x1xf32>
    %138 = vector.broadcast %129 : vector<1x1xf32> to vector<16x1xf32>
    %139 = arith.addf %137, %138 : vector<16x1xf32>
    %140 = vector.broadcast %127 : vector<1x8xf32> to vector<16x8xf32>
    %141 = arith.mulf %115, %140 : vector<16x8xf32>
    %cst_115 = arith.constant dense<0.000000e+00> : vector<16xf32>
    %142 = vector.multi_reduction <add>, %141, %cst_115 [1] : vector<16x8xf32> to vector<16xf32>
    %143 = vector.shape_cast %142 : vector<16xf32> to vector<16x1xf32>
    %144 = vector.broadcast %129 : vector<1x1xf32> to vector<16x1xf32>
    %145 = arith.addf %143, %144 : vector<16x1xf32>
    %146 = arith.maximumf %139, %145 : vector<16x1xf32>
    %147 = arith.subf %139, %146 : vector<16x1xf32>
    %148 = math.exp %147 : vector<16x1xf32>
    %149 = arith.subf %145, %146 : vector<16x1xf32>
    %150 = math.exp %149 : vector<16x1xf32>
    %151 = arith.addf %148, %150 : vector<16x1xf32>
    %152 = tpu.reciprocal %151 {approx = true} : vector<16x1xf32> -> vector<16x1xf32>
    %153 = arith.mulf %148, %152 : vector<16x1xf32>
    %154 = vector.broadcast %153 : vector<16x1xf32> to vector<16x8xf32>
    %155 = arith.mulf %84, %154 : vector<16x8xf32>
    %156 = arith.mulf %150, %152 : vector<16x1xf32>
    %157 = vector.broadcast %156 : vector<16x1xf32> to vector<16x8xf32>
    %158 = arith.mulf %115, %157 : vector<16x8xf32>
    %159 = arith.addf %155, %158 : vector<16x8xf32>
    %160 = vector.broadcast %131 : vector<1x8xf32> to vector<16x8xf32>
    %161 = arith.mulf %24, %160 : vector<16x8xf32>
    %cst_116 = arith.constant dense<0.000000e+00> : vector<16xf32>
    %162 = vector.multi_reduction <add>, %161, %cst_116 [1] : vector<16x8xf32> to vector<16xf32>
    %163 = vector.shape_cast %162 : vector<16xf32> to vector<16x1xf32>
    %164 = vector.broadcast %133 : vector<1x1xf32> to vector<16x1xf32>
    %165 = arith.addf %163, %164 : vector<16x1xf32>
    %166 = vector.broadcast %131 : vector<1x8xf32> to vector<16x8xf32>
    %167 = arith.mulf %53, %166 : vector<16x8xf32>
    %cst_117 = arith.constant dense<0.000000e+00> : vector<16xf32>
    %168 = vector.multi_reduction <add>, %167, %cst_117 [1] : vector<16x8xf32> to vector<16xf32>
    %169 = vector.shape_cast %168 : vector<16xf32> to vector<16x1xf32>
    %170 = vector.broadcast %133 : vector<1x1xf32> to vector<16x1xf32>
    %171 = arith.addf %169, %170 : vector<16x1xf32>
    %172 = arith.maximumf %165, %171 : vector<16x1xf32>
    %173 = arith.subf %165, %172 : vector<16x1xf32>
    %174 = math.exp %173 : vector<16x1xf32>
    %175 = arith.subf %171, %172 : vector<16x1xf32>
    %176 = math.exp %175 : vector<16x1xf32>
    %177 = arith.addf %174, %176 : vector<16x1xf32>
    %178 = tpu.reciprocal %177 {approx = true} : vector<16x1xf32> -> vector<16x1xf32>
    %179 = arith.mulf %174, %178 : vector<16x1xf32>
    %180 = vector.broadcast %179 : vector<16x1xf32> to vector<16x8xf32>
    %181 = arith.mulf %24, %180 : vector<16x8xf32>
    %182 = arith.mulf %176, %178 : vector<16x1xf32>
    %183 = vector.broadcast %182 : vector<16x1xf32> to vector<16x8xf32>
    %184 = arith.mulf %53, %183 : vector<16x8xf32>
    %185 = arith.addf %181, %184 : vector<16x8xf32>
    %186 = vector.broadcast %131 : vector<1x8xf32> to vector<16x8xf32>
    %187 = arith.mulf %84, %186 : vector<16x8xf32>
    %cst_118 = arith.constant dense<0.000000e+00> : vector<16xf32>
    %188 = vector.multi_reduction <add>, %187, %cst_118 [1] : vector<16x8xf32> to vector<16xf32>
    %189 = vector.shape_cast %188 : vector<16xf32> to vector<16x1xf32>
    %190 = vector.broadcast %133 : vector<1x1xf32> to vector<16x1xf32>
    %191 = arith.addf %189, %190 : vector<16x1xf32>
    %192 = vector.broadcast %131 : vector<1x8xf32> to vector<16x8xf32>
    %193 = arith.mulf %115, %192 : vector<16x8xf32>
    %cst_119 = arith.constant dense<0.000000e+00> : vector<16xf32>
    %194 = vector.multi_reduction <add>, %193, %cst_119 [1] : vector<16x8xf32> to vector<16xf32>
    %195 = vector.shape_cast %194 : vector<16xf32> to vector<16x1xf32>
    %196 = vector.broadcast %133 : vector<1x1xf32> to vector<16x1xf32>
    %197 = arith.addf %195, %196 : vector<16x1xf32>
    %198 = arith.maximumf %191, %197 : vector<16x1xf32>
    %199 = arith.subf %191, %198 : vector<16x1xf32>
    %200 = math.exp %199 : vector<16x1xf32>
    %201 = arith.subf %197, %198 : vector<16x1xf32>
    %202 = math.exp %201 : vector<16x1xf32>
    %203 = arith.addf %200, %202 : vector<16x1xf32>
    %204 = tpu.reciprocal %203 {approx = true} : vector<16x1xf32> -> vector<16x1xf32>
    %205 = arith.mulf %200, %204 : vector<16x1xf32>
    %206 = vector.broadcast %205 : vector<16x1xf32> to vector<16x8xf32>
    %207 = arith.mulf %84, %206 : vector<16x8xf32>
    %208 = arith.mulf %202, %204 : vector<16x1xf32>
    %209 = vector.broadcast %208 : vector<16x1xf32> to vector<16x8xf32>
    %210 = arith.mulf %115, %209 : vector<16x8xf32>
    %211 = arith.addf %207, %210 : vector<16x8xf32>
    %212 = arith.mulf %24, %24 : vector<16x8xf32>
    %cst_120 = arith.constant dense<0.000000e+00> : vector<16xf32>
    %213 = vector.multi_reduction <add>, %212, %cst_120 [1] : vector<16x8xf32> to vector<16xf32>
    %214 = vector.shape_cast %213 : vector<16xf32> to vector<16x1xf32>
    %215 = math.sqrt %214 : vector<16x1xf32>
    %cst_121 = arith.constant 9.99999997E-7 : f32
    %216 = vector.broadcast %cst_121 : f32 to vector<16x1xf32>
    %217 = arith.addf %215, %216 : vector<16x1xf32>
    %218 = tpu.reciprocal %217 {approx = true} : vector<16x1xf32> -> vector<16x1xf32>
    %219 = vector.broadcast %218 : vector<16x1xf32> to vector<16x8xf32>
    %220 = arith.mulf %24, %219 : vector<16x8xf32>
    %221 = arith.mulf %84, %84 : vector<16x8xf32>
    %cst_122 = arith.constant dense<0.000000e+00> : vector<16xf32>
    %222 = vector.multi_reduction <add>, %221, %cst_122 [1] : vector<16x8xf32> to vector<16xf32>
    %223 = vector.shape_cast %222 : vector<16xf32> to vector<16x1xf32>
    %224 = math.sqrt %223 : vector<16x1xf32>
    %cst_123 = arith.constant 9.99999997E-7 : f32
    %225 = vector.broadcast %cst_123 : f32 to vector<16x1xf32>
    %226 = arith.addf %224, %225 : vector<16x1xf32>
    %227 = tpu.reciprocal %226 {approx = true} : vector<16x1xf32> -> vector<16x1xf32>
    %228 = vector.broadcast %227 : vector<16x1xf32> to vector<16x8xf32>
    %229 = arith.mulf %84, %228 : vector<16x8xf32>
    %cst_124 = arith.constant dense<0.000000e+00> : vector<8x8xf32>
    %230 = tpu.matmul %220, %229, %cst_124 {dimension_numbers = #tpu.dot_dimension_numbers<[0], [0], [1], [1], [0, 1, 1, 1], [], []>} : vector<16x8xf32>, vector<16x8xf32>, vector<8x8xf32> -> vector<8x8xf32>
    %231 = arith.mulf %230, %230 : vector<8x8xf32>
    %232 = vector.shape_cast %231 : vector<8x8xf32> to vector<1x8x8xf32>
    %cst_125 = arith.constant dense<0.000000e+00> : vector<1xf32>
    %233 = vector.multi_reduction <add>, %232, %cst_125 [1, 2] : vector<1x8x8xf32> to vector<1xf32>
    %234 = vector.shape_cast %233 : vector<1xf32> to vector<1x1x1xf32>
    %235 = vector.extract %234[0, 0, 0] : f32 from vector<1x1x1xf32>
    %236 = vector.broadcast %235 : f32 to vector<1x1xf32>
    %cst_126 = arith.constant 6.400000e+01 : f32
    %237 = vector.broadcast %cst_126 : f32 to vector<1x1xf32>
    %238 = arith.divf %236, %237 : vector<1x1xf32>
    %cst_127 = arith.constant 1.000000e+00 : f32
    %239 = vector.broadcast %cst_127 : f32 to vector<16x40xf32>
    %240 = vector.broadcast %238 : vector<1x1xf32> to vector<16x40xf32>
    %241 = arith.mulf %240, %239 : vector<16x40xf32>
    %242 = tpu.concatenate %24, %53, %84, %115, %34, %63, %94, %125, %159, %185, %211, %241 in 1 : vector<16x8xf32>, vector<16x8xf32>, vector<16x8xf32>, vector<16x8xf32>, vector<16x8xf32>, vector<16x8xf32>, vector<16x8xf32>, vector<16x8xf32>, vector<16x8xf32>, vector<16x8xf32>, vector<16x8xf32>, vector<16x40xf32> -> vector<16x128xf32>
    %c0_128 = arith.constant 0 : index
    %c0_129 = arith.constant 0 : index
    %c0_130 = arith.constant 0 : index
    %243 = vector.load %arg14[%c0_128, %c0_129, %c0_130] : memref<1x16x128xf32, #tpu.memory_space<vmem>>, vector<1x16x128xf32>
    %244 = vector.shape_cast %243 : vector<1x16x128xf32> to vector<16x128xf32>
    %245 = vector.shape_cast %242 : vector<16x128xf32> to vector<1x16x128xf32>
    tpu.vector_store %arg14[%c0_128, %c0_129, %c0_130], %245 {strides = array<i32>} : memref<1x16x128xf32, #tpu.memory_space<vmem>>, vector<1x16x128xf32>,
    return
  }
  func.func @transform_0(%arg0: i32) -> (i32, i32, i32) {
    %c0_i32 = arith.constant 0 : i32
    %c0_i32_0 = arith.constant 0 : i32
    %c0_i32_1 = arith.constant 0 : i32
    return %arg0, %c0_i32, %c0_i32_0 : i32, i32, i32
  }
  func.func @transform_1(%arg0: i32) -> (i32, i32, i32) {
    %c0_i32 = arith.constant 0 : i32
    %c0_i32_0 = arith.constant 0 : i32
    %c0_i32_1 = arith.constant 0 : i32
    return %arg0, %c0_i32, %c0_i32_0 : i32, i32, i32
  }
  func.func @transform_2(%arg0: i32) -> (i32, i32, i32) {
    %c0_i32 = arith.constant 0 : i32
    %c0_i32_0 = arith.constant 0 : i32
    %c0_i32_1 = arith.constant 0 : i32
    return %arg0, %c0_i32, %c0_i32_0 : i32, i32, i32
  }
  func.func @transform_3(%arg0: i32) -> (i32, i32, i32) {
    %c0_i32 = arith.constant 0 : i32
    %c0_i32_0 = arith.constant 0 : i32
    %c0_i32_1 = arith.constant 0 : i32
    %c0_i32_2 = arith.constant 0 : i32
    return %c0_i32, %c0_i32_0, %c0_i32_1 : i32, i32, i32
  }
  func.func @transform_4(%arg0: i32) -> (i32, i32, i32) {
    %c0_i32 = arith.constant 0 : i32
    %c0_i32_0 = arith.constant 0 : i32
    %c0_i32_1 = arith.constant 0 : i32
    %c0_i32_2 = arith.constant 0 : i32
    return %c0_i32, %c0_i32_0, %c0_i32_1 : i32, i32, i32
  }
  func.func @transform_5(%arg0: i32) -> (i32, i32, i32) {
    %c0_i32 = arith.constant 0 : i32
    %c0_i32_0 = arith.constant 0 : i32
    %c0_i32_1 = arith.constant 0 : i32
    %c0_i32_2 = arith.constant 0 : i32
    return %c0_i32, %c0_i32_0, %c0_i32_1 : i32, i32, i32
  }
  func.func @transform_6(%arg0: i32) -> (i32, i32, i32) {
    %c0_i32 = arith.constant 0 : i32
    %c0_i32_0 = arith.constant 0 : i32
    %c0_i32_1 = arith.constant 0 : i32
    %c0_i32_2 = arith.constant 0 : i32
    return %c0_i32, %c0_i32_0, %c0_i32_1 : i32, i32, i32
  }
  func.func @transform_7(%arg0: i32) -> (i32, i32, i32) {
    %c0_i32 = arith.constant 0 : i32
    %c0_i32_0 = arith.constant 0 : i32
    %c0_i32_1 = arith.constant 0 : i32
    %c0_i32_2 = arith.constant 0 : i32
    return %c0_i32, %c0_i32_0, %c0_i32_1 : i32, i32, i32
  }
  func.func @transform_8(%arg0: i32) -> (i32, i32, i32) {
    %c0_i32 = arith.constant 0 : i32
    %c0_i32_0 = arith.constant 0 : i32
    %c0_i32_1 = arith.constant 0 : i32
    %c0_i32_2 = arith.constant 0 : i32
    return %c0_i32, %c0_i32_0, %c0_i32_1 : i32, i32, i32
  }
  func.func @transform_9(%arg0: i32) -> (i32, i32, i32) {
    %c0_i32 = arith.constant 0 : i32
    %c0_i32_0 = arith.constant 0 : i32
    %c0_i32_1 = arith.constant 0 : i32
    %c0_i32_2 = arith.constant 0 : i32
    return %c0_i32, %c0_i32_0, %c0_i32_1 : i32, i32, i32
  }
  func.func @transform_10(%arg0: i32) -> (i32, i32, i32) {
    %c0_i32 = arith.constant 0 : i32
    %c0_i32_0 = arith.constant 0 : i32
    %c0_i32_1 = arith.constant 0 : i32
    %c0_i32_2 = arith.constant 0 : i32
    return %c0_i32, %c0_i32_0, %c0_i32_1 : i32, i32, i32
  }
  func.func @transform_11(%arg0: i32) -> (i32, i32, i32) {
    %c0_i32 = arith.constant 0 : i32
    %c0_i32_0 = arith.constant 0 : i32
    %c0_i32_1 = arith.constant 0 : i32
    return %arg0, %c0_i32, %c0_i32_0 : i32, i32, i32
  }
  func.func @transform_12(%arg0: i32) -> (i32, i32, i32) {
    %c0_i32 = arith.constant 0 : i32
    %c0_i32_0 = arith.constant 0 : i32
    %c0_i32_1 = arith.constant 0 : i32
    return %arg0, %c0_i32, %c0_i32_0 : i32, i32, i32
  }
  func.func @transform_13(%arg0: i32) -> (i32, i32, i32) {
    %c0_i32 = arith.constant 0 : i32
    %c0_i32_0 = arith.constant 0 : i32
    %c0_i32_1 = arith.constant 0 : i32
    return %arg0, %c0_i32, %c0_i32_0 : i32, i32, i32
  }
}

</mosaic_0001>

<bundles_post_ra>
// kernel: asn_forward.1
= control target key start
LH: loop header
LB: loop body
LE: loop exit
PB: predicated region body
PF: predicated region fallthrough
CT: control target
= control target key end

     0   :  { %s2444_s0 = inlined_call_operand.vmem [shape: bf16[2,16,32], index: 0, kind: input, shape index: {}]   ;;  %s2445_s1 = inlined_call_operand.vmem [shape: bf16[2,16,16], index: 1, kind: input, shape index: {}]   ;;  %s2446_s2 = inlined_call_operand.vmem [shape: bf16[2,16,16], index: 2, kind: input, shape index: {}]   ;;  %s2447_s3 = inlined_call_operand.hbm [shape: bf16[4,32,16], index: 3, kind: input, shape index: {}]   ;;  %s2448_s4 = inlined_call_operand.vmem [shape: f32[4,1,16], index: 4, kind: input, shape index: {}]   ;;  %s2449_s5 = inlined_call_operand.vmem [shape: bf16[4,16,8], index: 5, kind: input, shape index: {}]   ;;  %s2450_s6 = inlined_call_operand.vmem [shape: f32[4,1,8], index: 6, kind: input, shape index: {}]   ;;  %s2451_s7 = inlined_call_operand.vmem [shape: bf16[4,16,8], index: 7, kind: input, shape index: {}]   ;;  %s2452_s8 = inlined_call_operand.vmem [shape: f32[4,1,8], index: 8, kind: input, shape index: {}]   ;;  %s2453_s9 = inlined_call_operand.vmem [shape: f32[1,1,8], index: 9, kind: input, shape index: {}]   ;;  %s2454_s10 = inlined_call_operand.<no memory space> [shape: f32[1,1,1], index: 10, kind: input, shape index: {}]   ;;  %s2455_s11 = inlined_call_operand.vmem [shape: f32[2,1,8], index: 11, kind: input, shape index: {}]   ;;  %s2456_s12 = inlined_call_operand.vmem [shape: f32[2,1,1], index: 12, kind: input, shape index: {}]   ;;  %s2457_s13 = inlined_call_operand.vmem [shape: f32[2,16,128], index: 13, kind: output, shape index: {}]  }
   0x1   :  { %v18_v0 = vstv %s2454_s10 }
   0x2   :  { %19 = vst [vmem:[#allocation2] sm:$0x1] %v18_v0 }
   0x3   :  { %20 = vsyncpa [#allocation4], 0  ;;  %s2117_s27 = smov 0  }
   0x4 LB: > { %s366_s30 = sshll.u32 %s2447_s3, 4  ;;  %s1716_s14 = sadd.s32 4294967295, %s2027_s27   ;;  %s2027_s27 = sphi %s2117_s27, %s26_s27   ;;  %s367_s30 = int_to_ptr.hbm [resolvable:$true] %s366_s30 }
   0x5   : > { %p1718_p0 = scmp.ge.s32.totalorder %s2027_s27, 1  ;;  %p355_p1 = scmp.lt.s32.totalorder %s2027_s27, 3 }
   0x6   : > { %p1888_p2 = scmp.eq.s32.totalorder %s1716_s14, 0  ;;  %s2029_s10 = smov [#allocation3]  }
   0x7   : > { %p356_p3 = pnand %p1718_p0, %p355_p1  ;;  %s368_s15 = sshll.u32 %s2029_s10, 4  ;;  %s369_s15 = int_to_ptr.vmem [resolvable:$true] %s368_s15 }
   0x8   : > { %s2030_s16 = smov 64   ;;  %s2031_s17 = smov 4  }
   0x9   : > { %p1884_p4 = pneg %p356_p3  ;;  %441 = sbr.rel (%p356_p3) target bundleno = 2021 (0x7e5), region = 72 }
   0xb   : > { %p1885_p5 = pnand %p1888_p2, %p1884_p4 }
   0xd   : > { %1887 = dma.hbm_to_vmem [thread:$0]  (!%p1885_p5), %s367_s30, 1024, %s369_s15, [#allocation4], %s2030_s16, %s2030_s16, %s2031_s17  }
   0xe   : > { %2022 = dma.done.wait (%p1888_p2), [#allocation4], 1024  }
   0xf   : > { %2024 = vsyncadd (%p1888_p2), [#allocation4], 4294966272  ;;  %p502_p6 = scmp.lt.s32.totalorder %s1716_s14, 1  ;;  %v1863_v1 = vld [vmem:[#allocation3 + $0x8] sm:$0xff]  ;;  %v1862_v2 = vld [vmem:[#allocation3] sm:$0xff]  ;;  %vm556_vm0 = vcmask 261120  }
  0x10   : > { %566 = vmatpush.bf16.msra.mxu0 %v1863_v1  ;;  %vm584_vm1 = vcmask 130048   ;;  %v1864_v8 = vld [vmem:[%s2449_s5] sm:$0xff]  ;;  %v1866_v23 = vld [vmem:[#allocation3 + $0x10] sm:$0xff]  ;;  %vm1132_vm2 = vcmask 64512   ;;  %v1868_v45 = vld [vmem:[%s2449_s5 + $0x8] sm:$0xff]  ;;  %s2035_s16 = smov 8  }
  0x11   : > { %s2459_s14 = smov (!%p502_p6, %s1716_s14), 1  ;;  %v1865_v9 = vld [vmem:[%s2451_s7] sm:$0xff]  ;;  %621 = vmatpush.bf16.msra.mxu2 %v1864_v8  ;;  %v1869_v46 = vld [vmem:[%s2451_s7 + $0x8] sm:$0xff]  ;;  %s2036_s20 = smov 16   ;;  %vm1579_vm11 = vcmask 195584   ;;  %vm1584_vm12 = vcmask 326656  }
  0x12   : > { %s2131_s18 = sshll.u32 %s2459_s14, 3  ;;  %s519_s24 = scalar_lea.vmem %s2455_s11, %s2459_s14  ;;  %v1919_v11 = vld [vmem:[%s2448_s4] ss:$0 sm:$0xff]  ;;  %v1871_v50 = vld [vmem:[#allocation3 + $0x28] sm:$0xff]  ;;  %v1870_v53 = vld [vmem:[#allocation3 + $0x20] sm:$0xff]  ;;  %vm1587_vm13 = vcmask 392192  }
  0x13   : > { %s506_s21 = scalar_lea.vmem %s2444_s0, %s2131_s18  ;;  %s522_s28 = scalar_lea.vmem %s2456_s12, %s2459_s14  ;;  %v1867_v21 = vld [vmem:[#allocation3 + $0x18] sm:$0xff]  ;;  %vm1590_vm15 = vcmask 457728  }
  0x14   : > { %v2145_v3 = vld [vmem:[%s506_s21] sm:$0xff]  ;;  %567 = vmatpush.bf16.msra.mxu0 %v1862_v2  ;;  %s511_s10 = scalar_lea.vmem %s2445_s1, %s2131_s18  ;;  %s2037_s21 = smov 56  }
  0x15   : > { %v2153_v7 = vld [vmem:[%s511_s10] sm:$0xff]  ;;  %s516_s10 = scalar_lea.vmem %s2446_s2, %s2131_s18  ;;  %s2034_s18 = smov 40  }
  0x16   : > { %v1920_v24 = vld [vmem:[%s2450_s6] ss:$0 sm:$0xff]  ;;  %s2038_s22 = smov 24   ;;  %s2040_s26 = smov 72  }
  0x17   : > { %1743 = vmatmul.msk.bf16.vlgmr.msra.gmra.mxu0 %vm556_vm0, %v2145_v3  ;;  %v2192_v33 = vld [vmem:[%s519_s24] ss:$0 sm:$0xff]  ;;  %s2041_s29 = smov 64   ;;  %s2042_s30 = smov 80  }
  0x18   : > { %v2201_v39 = vld [vmem:[%s516_s10] sm:$0xff]  ;;  %s2033_s10 = smov 32   ;;  %s1858_s24 = sshll.u32 %s2459_s14, 4 }
  0x94   : > { %v569_v4 = vpop.f32.mrf.mxu0 }
  0x9c   : > { %v571_v5 = vpop.f32.mrf.mxu0 }
  0x9d   : > { %v574_v6 = vpack.c.bf16 %v571_v5, %v569_v4 }
  0x9f   : > { %595 = vmatpush.bf16.msra.mxu1 %v574_v6 }
  0xa2   : > { %1748 = vmatmul.msk.bf16.vlgmr.msra.gmra.mxu1 %vm584_vm1, %v2153_v7 }
  0xa3   : > { %662 = vmatpush.bf16.msrb.mxu1 %v1865_v9 }
  0xa7   : > { %767 = vmatpush.bf16.msra.mxu1 %v1868_v45 }
 0x11f   : > { %v597_v10 = vpop.f32.mrf.mxu1 }
 0x120   : > { %v598_v13 = vadd.f32 %v1919_v11, %v597_v10  ;;  %v1921_v10 = vld [vmem:[%s2448_s4 + $0x1] ss:$0 sm:$0xff] }
 0x127   : > { %v599_v12 = vpop.f32.mrf.mxu1 }
 0x128   : > { %v600_v14 = vadd.f32 %v1919_v11, %v599_v12 }
 0x12a   : > { %v604_v15 = vpack.c.bf16 %v600_v14, %v598_v13 }
 0x12c   : > { %1753 = vmatmul.msk.bf16.vlgmr.msra.gmra.mxu2 %vm584_vm1, %v604_v15  ;;  %1759 = vmatmul.msk.bf16.vlgmr.msrb.gmra.mxu1 %vm584_vm1, %v604_v15 }
 0x12d   : > { %860 = vmatpush.bf16.msrb.mxu1 %v1871_v50 }
 0x131   : > { %861 = vmatpush.bf16.msrb.mxu1 %v1870_v53 }
 0x1a9   : > { %v664_v16 = vpop.f32.mrf.mxu1 }
 0x1af   : > { %v623_v17 = vpop.f32.mrf.mxu2 }
 0x1b1   : > { %v666_v18 = vpop.f32.mrf.mxu1 }
 0x1b2   : > { %v669_v19 = vpack.c.bf16 %v666_v18, %v664_v16 }
 0x1b4   : > { %681 = vmatpush.bf16.msrb.mxu2 %v669_v19 }
 0x1b7   : > { %v625_v20 = vpop.f32.mrf.mxu2  ;;  %1760 = vmatmul.msk.bf16.vlgmr.msrb.gmra.mxu2 %vm584_vm1, %v2153_v7 }
 0x1b8   : > { %v628_v22 = vpack.c.bf16 %v625_v20, %v623_v17 }
 0x1ba   : > { %640 = vmatpush.bf16.msra.mxu3 %v628_v22 }
 0x1bd   : > { %1754 = vmatmul.msk.bf16.vlgmr.msra.gmra.mxu3 %vm584_vm1, %v2153_v7 }
 0x1be   : > { %711 = vmatpush.bf16.msrb.mxu3 %v1867_v21 }
 0x1c2   : > { %712 = vmatpush.bf16.msrb.mxu3 %v1866_v23 }
 0x1c6   : > { %810 = vmatpush.bf16.msra.mxu3 %v1869_v46 }
 0x1cd   : > { %1769 = vmatmul.msk.bf16.vlgmr.msrb.gmra.mxu3 %vm556_vm0, %v2145_v3 }
 0x240   : > { %v642_v25 = vpop.f32.mrf.mxu3 }
 0x241   : > { %v2177_v26 = vadd.f32 %v1920_v24, %v642_v25  ;;  %v2226_v25 = vpop.f32.mrf.mxu2 }
 0x243   : > { %v1344_v27 = vmul.f32 %v2177_v26, %v2177_v26 }
 0x245   : > { %v1346_v28 = vsel %vm1132_vm2, %v1344_v27, 0.0 }
 0x246   : > { %1347 = vadd.xlane.f32.xlu0 %v1346_v28  ;;  %v1872_v28 = vld [vmem:[%s2449_s5 + $0x10] sm:$0xff] }
 0x247   : > { %910 = vmatpush.bf16.msrb.mxu3 %v1872_v28 }
 0x248   : > { %v644_v29 = vpop.f32.mrf.mxu3 }
 0x249   : > { %v2182_v30 = vadd.f32 %v1920_v24, %v644_v29  ;;  %v2228_v27 = vpop.f32.mrf.mxu2  ;;  %v1873_v29 = vld [vmem:[%s2451_s7 + $0x10] sm:$0xff] }
 0x24b   : > { %v1345_v31 = vmul.f32 %v2182_v30, %v2182_v30  ;;  %v1206_v35 = vmul.f32 %v2192_v33, %v2182_v30 }
 0x24d   : > { %v1349_v32 = vsel %vm1132_vm2, %v1345_v31, 0.0  ;;  %v1210_v36 = vsel %vm1132_vm2, %v1206_v35, 0.0  ;;  %v1875_v31 = vld [vmem:[#allocation3 + $0x38] sm:$0xff] }
 0x24e   : > { %1350 = vadd.xlane.f32.xlu0 %v1349_v32 }
 0x250   : > { %v714_v34 = vpop.f32.mrf.mxu3 }
 0x256   : > { %1211 = vadd.xlane.f32.xlu0 %v1210_v36 }
 0x258   : > { %v716_v37 = vpop.f32.mrf.mxu3 }
 0x259   : > { %v719_v38 = vpack.c.bf16 %v716_v37, %v714_v34  ;;  %v1874_v34 = vld [vmem:[#allocation3 + $0x30] sm:$0xff]  ;;  %v1924_v37 = vld [vmem:[%s2448_s4 + $0x2] ss:$0 sm:$0xff] }
 0x25b   : > { %740 = vmatpush.bf16.msrb.mxu0 %v719_v38 }
 0x25e   : > { %1775 = vmatmul.msk.bf16.vlgmr.msrb.gmra.mxu0 %vm584_vm1, %v2201_v39 }
 0x2b9   : > { %v1348_v40 = vpop.xlane.xlu0 %1347 }
 0x2ba   : > { %1933 = vrsqrt.f32 %v1348_v40  ;;  %vm1359_vm3 = vcmp.eq.f32.partialorder %v1348_v40, inf  ;;  %v1362_v56 = vand.u32 2147483648, %v1348_v40  ;;  %vm1361_vm4 = vcmp.eq.f32.partialorder %v1348_v40, 0.0 }
 0x2c0   : > { %v1934_v41 = vpop.eup %1933 }
 0x2c1   : > { %v1353_v42 = vmul.f32 %v1934_v41, %v1348_v40  ;;  %v1351_v43 = vpop.xlane.xlu0 %1350 }
 0x2c2   : > { %1935 = vrsqrt.f32 %v1351_v43  ;;  %vm1371_vm5 = vcmp.eq.f32.partialorder %v1351_v43, inf  ;;  %v1374_v0 = vand.u32 2147483648, %v1351_v43  ;;  %vm1373_vm6 = vcmp.eq.f32.partialorder %v1351_v43, 0.0 }
 0x2c3   : > { %v1354_v44 = vmul.f32 %v1934_v41, %v1353_v42 }
 0x2c5   : > { %v1355_v47 = vmul.f32 0.5, %v1354_v44 }
 0x2c7   : > { %v1356_v48 = vsub.f32 1.5, %v1355_v47 }
 0x2c8   : > { %v1936_v49 = vpop.eup %1935 }
 0x2c9   : > { %v1365_v51 = vmul.f32 %v1936_v49, %v1351_v43  ;;  %v1357_v52 = vmul.f32 %v1934_v41, %v1356_v48 }
 0x2cb   : > { %v1366_v54 = vmul.f32 %v1936_v49, %v1365_v51  ;;  %v1358_v55 = vmul.f32 %v1357_v52, %v1348_v40 }
 0x2cd   : > { %v1367_v57 = vmul.f32 0.5, %v1366_v54  ;;  %v1360_v58 = vsel %vm1359_vm3, %v1348_v40, %v1358_v55  ;;  %v1876_v55 = vld [vmem:[%s2449_s5 + $0x18] sm:$0xff]  ;;  %vm1596_vm3 = vcmask 588800  }
 0x2ce   : > { %v1363_v59 = vsel %vm1361_vm4, %v1362_v56, %v1360_v58  ;;  %v1877_v56 = vld [vmem:[%s2451_s7 + $0x18] sm:$0xff]  ;;  %vm1593_vm4 = vcmask 523264  }
 0x2cf   : > { %v1368_v60 = vsub.f32 1.5, %v1367_v57  ;;  %v1376_v61 = vadd.f32 1e-06, %v1363_v59  ;;  %v2267_v57 = vld [vmem:[%s2453_s9] ss:$0 sm:$0xff] }
 0x2d1   : > { %v1369_v62 = vmul.f32 %v1936_v49, %v1368_v60  ;;  %1937 = vrcp.f32 %v1376_v61 }
 0x2d3   : > { %v1370_v63 = vmul.f32 %v1369_v62, %v1351_v43 }
 0x2d5   : > { %v1372_v1 = vsel %vm1371_vm5, %v1351_v43, %v1370_v63  ;;  %v1923_v63 = vld [vmem:[%s2450_s6 + $0x1] ss:$0 sm:$0xff]  ;;  %vm1599_vm5 = vcmask 654336  }
 0x2d6   : > { %v1375_v2 = vsel %vm1373_vm6, %v1374_v0, %v1372_v1  ;;  %vm1602_vm6 = vcmask 719872  }
 0x2d7   : > { %v1938_v4 = vpop.eup %1937  ;;  %v1377_v5 = vadd.f32 1e-06, %v1375_v2 }
 0x2d8   : > { %v1380_v6 = vmul.f32 %v1938_v4, %v2177_v26 }
 0x2d9   : > { %1939 = vrcp.f32 %v1377_v5 }
 0x2da   : > { %1420 = vxpose.xlu2.b32.start [1/2] (short) (narrow) %v1380_v6, 8 }
 0x2db   : > { %v742_v8 = vpop.f32.mrf.mxu0 }
 0x2dc   : > { %v743_v13 = vadd.f32 %v1921_v10, %v742_v8 }
 0x2df   : > { %v1940_v9 = vpop.eup %1939 }
 0x2e0   : > { %v1381_v11 = vmul.f32 %v1940_v9, %v2182_v30 }
 0x2e2   : > { %1421 = vxpose.xlu2.b32.end [2/2] (short) (narrow) %v1381_v11, 8  ;;  %v1928_v11 = vld [vmem:[%s2448_s4 + $0x3] ss:$0 sm:$0xff] }
 0x2e3   : > { %v744_v12 = vpop.f32.mrf.mxu0 }
 0x2e4   : > { %v745_v14 = vadd.f32 %v1921_v10, %v744_v12 }
 0x2e6   : > { %v750_v15 = vpack.c.bf16 %v745_v14, %v743_v13 }
 0x2e8   : > { %1782 = vmatmul.msk.bf16.vlgmr.msra.gmra.mxu1 %vm584_vm1, %v750_v15  ;;  %1791 = vmatmul.msk.bf16.vlgmr.msra.gmra.mxu3 %vm584_vm1, %v750_v15 }
 0x2e9   : > { %953 = vmatpush.bf16.msra.mxu1 %v1873_v29  ;;  %1003 = vmatpush.bf16.msra.mxu3 %v1875_v31 }
 0x2ed   : > { %1004 = vmatpush.bf16.msra.mxu3 %v1874_v34 }
 0x2f8   : > { %1802 = vmatmul.msk.bf16.vlgmr.msrb.gmra.mxu1 %vm556_vm0, %v2145_v3 }
 0x2f9   : > { %1053 = vmatpush.bf16.msrb.mxu1 %v1876_v55 }
 0x365   : > { %v769_v16 = vpop.f32.mrf.mxu1 }
 0x36b   : > { %v812_v17 = vpop.f32.mrf.mxu3 }
 0x36d   : > { %v771_v18 = vpop.f32.mrf.mxu1 }
 0x36e   : > { %v774_v19 = vpack.c.bf16 %v771_v18, %v769_v16 }
 0x370   : > { %787 = vmatpush.bf16.msra.mxu2 %v774_v19 }
 0x373   : > { %1784 = vmatmul.msk.bf16.vlgmr.msra.gmra.mxu2 %vm584_vm1, %v2201_v39  ;;  %v814_v20 = vpop.f32.mrf.mxu3  ;;  %v2310_v31 = vpop.trf.xlu2 }
 0x374   : > { %v817_v21 = vpack.c.bf16 %v814_v20, %v812_v17  ;;  %v1205_v17 = vmul.f32 %v2192_v33, %v2177_v26 }
 0x375   : > { %v863_v22 = vpop.f32.mrf.mxu1 }
 0x376   : > { %830 = vmatpush.bf16.msra.mxu0 %v817_v21 }
 0x379   : > { %1793 = vmatmul.msk.bf16.vlgmr.msra.gmra.mxu0 %vm584_vm1, %v2201_v39 }
 0x37d   : > { %v865_v23 = vpop.f32.mrf.mxu1 }
 0x37e   : > { %v868_v24 = vpack.c.bf16 %v865_v23, %v863_v22  ;;  %v1207_v22 = vsel %vm1132_vm2, %v1205_v17, 0.0 }
 0x380   : > { %881 = vmatpush.bf16.msrb.mxu2 %v868_v24 }
 0x383   : > { %1804 = vmatmul.msk.bf16.vlgmr.msrb.gmra.mxu2 %vm584_vm1, %v2153_v7 }
 0x3f6   : > { %v789_v32 = vpop.f32.mrf.mxu2 }
 0x3f7   : > { %v2283_v4 = vadd.f32 %v1923_v63, %v789_v32 }
 0x3f9   : > { %v1218_v10 = vmul.f32 %v2192_v33, %v2283_v4 }
 0x3fb   : > { %v1220_v13 = vsel %vm1132_vm2, %v1218_v10, 0.0 }
 0x3fe   : > { %v2236_v35 = vpop.f32.mrf.mxu2 }
 0x3ff   : > { %v2299_v20 = vadd.f32 %v1923_v63, %v2236_v35  ;;  %v1212_v63 = vpop.xlane.xlu0 %1211 }
 0x401   : > { %v1219_v23 = vmul.f32 %v2192_v33, %v2299_v20 }
 0x403   : > { %v1223_v24 = vsel %vm1132_vm2, %v1219_v23, 0.0 }
 0x406   : > { %v883_v36 = vpop.f32.mrf.mxu2 }
 0x407   : > { %v884_v38 = vadd.f32 %v1924_v37, %v883_v36 }
 0x409   : > { %v888_v42 = vmax.f32 %v884_v38, 0.0 }
 0x40e   : > { %v885_v40 = vpop.f32.mrf.mxu2 }
 0x40f   : > { %v886_v41 = vadd.f32 %v1924_v37, %v885_v40 }
 0x411   : > { %v889_v43 = vmax.f32 %v886_v41, 0.0  ;;  %v2032_v41 = vmov 0  }
 0x412   : > { %1914 = vset.pattern.permute.xlu0 %v2032_v41  ;;  %1915 = vset.pattern.permute.xlu1 %v2032_v41 }
 0x413   : > { %v893_v44 = vpack.c.bf16 %v889_v43, %v888_v42  ;;  %1916 = vset.pattern.permute.xlu2 %v2032_v41 }
 0x415   : > { %1811 = vmatmul.msk.bf16.vlgmr.msrb.gmra.mxu3 %vm584_vm1, %v893_v44  ;;  %1820 = vmatmul.msk.bf16.vlgmr.msra.gmra.mxu1 %vm584_vm1, %v893_v44 }
 0x416   : > { %1096 = vmatpush.bf16.msrb.mxu3 %v1877_v56 }
 0x425   : > { %1831 = vmatmul.msk.bf16.vlgmr.msra.gmra.mxu3 %vm556_vm0, %v2145_v3  ;;  %v2251_v3 = vpop.f32.mrf.mxu0 }
 0x42d   : > { %v2253_v54 = vpop.f32.mrf.mxu0 }
 0x492   : > { %v955_v45 = vpop.f32.mrf.mxu1 }
 0x498   : > { %v912_v46 = vpop.f32.mrf.mxu3 }
 0x49a   : > { %v957_v47 = vpop.f32.mrf.mxu1 }
 0x49b   : > { %v960_v48 = vpack.c.bf16 %v957_v47, %v955_v45 }
 0x49d   : > { %973 = vmatpush.bf16.msra.mxu2 %v960_v48 }
 0x4a0   : > { %v914_v49 = vpop.f32.mrf.mxu3  ;;  %1822 = vmatmul.msk.bf16.vlgmr.msra.gmra.mxu2 %vm584_vm1, %v2153_v7 }
 0x4a1   : > { %v917_v50 = vpack.c.bf16 %v914_v49, %v912_v46  ;;  %v2321_v46 = vld [vmem:[%s522_s28] ss:$0 sm:$0xff]  ;;  %s2039_s28 = smov 48  }
 0x4a2   : > { %v1217_v10 = vadd.f32 %v2321_v46, %v1212_v63 }
 0x4a3   : > { %930 = vmatpush.bf16.msrb.mxu0 %v917_v50 }
 0x4a6   : > { %1813 = vmatmul.msk.bf16.vlgmr.msrb.gmra.mxu0 %vm584_vm1, %v2153_v7  ;;  %v1926_v7 = vld [vmem:[%s2450_s6 + $0x2] ss:$0 sm:$0xff] }
 0x4a8   : > { %v1006_v51 = vpop.f32.mrf.mxu3 }
 0x4b0   : > { %v1008_v52 = vpop.f32.mrf.mxu3 }
 0x4b1   : > { %v1011_v53 = vpack.c.bf16 %v1008_v52, %v1006_v51 }
 0x4b3   : > { %1024 = vmatpush.bf16.msra.mxu0 %v1011_v53 }
 0x4b6   : > { %1833 = vmatmul.msk.bf16.vlgmr.msra.gmra.mxu0 %vm584_vm1, %v2201_v39 }
 0x523   : > { %v932_v58 = vpop.f32.mrf.mxu0 }
 0x524   : > { %v2269_v59 = vadd.f32 %v1926_v7, %v932_v58 }
 0x526   : > { %v1130_v60 = vmul.f32 %v2267_v57, %v2269_v59  ;;  %v1382_v9 = vmul.f32 %v2269_v59, %v2269_v59  ;;  %v1276_v28 = vmul.f32 %v2192_v33, %v2269_v59 }
 0x528   : > { %v1133_v61 = vsel %vm1132_vm2, %v1130_v60, 0.0  ;;  %v1384_v12 = vsel %vm1132_vm2, %v1382_v9, 0.0  ;;  %v1278_v29 = vsel %vm1132_vm2, %v1276_v28, 0.0 }
 0x529   : > { %1134 = vadd.xlane.f32.xlu2 %v1133_v61 }
 0x52b   : > { %v934_v62 = vpop.f32.mrf.mxu0 }
 0x52c   : > { %v2277_v0 = vadd.f32 %v1926_v7, %v934_v62 }
 0x52e   : > { %v1383_v1 = vmul.f32 %v2277_v0, %v2277_v0  ;;  %v1131_v2 = vmul.f32 %v2267_v57, %v2277_v0 }
 0x530   : > { %v1387_v5 = vsel %vm1132_vm2, %v1383_v1, 0.0  ;;  %v1136_v6 = vsel %vm1132_vm2, %v1131_v2, 0.0 }
 0x531   : > { %1388 = vadd.xlane.f32.xlu1 %v1387_v5  ;;  %1137 = vadd.xlane.f32.xlu2 %v1136_v6 }
 0x533   : > { %v1026_v8 = vpop.f32.mrf.mxu0 }
 0x534   : > { %v1027_v14 = vadd.f32 %v1928_v11, %v1026_v8 }
 0x536   : > { %v1031_v18 = vmax.f32 %v1027_v14, 0.0 }
 0x539   : > { %1385 = vadd.xlane.f32.xlu1 %v1384_v12  ;;  %1221 = vadd.xlane.f32.xlu2 %v1220_v13 }
 0x53b   : > { %v1028_v15 = vpop.f32.mrf.mxu0 }
 0x53c   : > { %v1029_v16 = vadd.f32 %v1928_v11, %v1028_v15 }
 0x53e   : > { %v1032_v19 = vmax.f32 %v1029_v16, 0.0 }
 0x540   : > { %v1036_v21 = vpack.c.bf16 %v1032_v19, %v1031_v18 }
 0x541   : > { %1208 = vadd.xlane.f32.xlu1 %v1207_v22 }
 0x542   : > { %1840 = vmatmul.msk.bf16.vlgmr.msrb.gmra.mxu1 %vm584_vm1, %v1036_v21  ;;  %1849 = vmatmul.msk.bf16.vlgmr.msrb.gmra.mxu3 %vm584_vm1, %v1036_v21 }
 0x549   : > { %1224 = vadd.xlane.f32.xlu1 %v1223_v24 }
 0x551   : > { %1279 = vadd.xlane.f32.xlu1 %v1278_v29 }
 0x59c   : > { %v2312_v32 = vpop.xlane.xlu2 %1134 }
 0x5a4   : > { %v1389_v34 = vpop.xlane.xlu1 %1388  ;;  %v2314_v35 = vpop.xlane.xlu2 %1137 }
 0x5a5   : > { %1941 = vrsqrt.f32 %v1389_v34  ;;  %vm1409_vm7 = vcmp.eq.f32.partialorder %v1389_v34, inf  ;;  %v1412_v55 = vand.u32 2147483648, %v1389_v34  ;;  %vm1411_vm8 = vcmp.eq.f32.partialorder %v1389_v34, 0.0 }
 0x5ab   : > { %v1942_v36 = vpop.eup %1941 }
 0x5ac   : > { %v1403_v37 = vmul.f32 %v1942_v36, %v1389_v34  ;;  %v1386_v38 = vpop.xlane.xlu1 %1385  ;;  %v1222_v44 = vpop.xlane.xlu2 %1221 }
 0x5ad   : > { %1943 = vrsqrt.f32 %v1386_v38  ;;  %v1226_v50 = vadd.f32 %v2321_v46, %v1222_v44  ;;  %vm1397_vm9 = vcmp.eq.f32.partialorder %v1386_v38, inf  ;;  %v1400_v13 = vand.u32 2147483648, %v1386_v38 }
 0x5ae   : > { %v1404_v40 = vmul.f32 %v1942_v36, %v1403_v37  ;;  %vm1399_vm10 = vcmp.eq.f32.partialorder %v1386_v38, 0.0 }
 0x5b0   : > { %v1405_v42 = vmul.f32 0.5, %v1404_v40 }
 0x5b2   : > { %v1406_v43 = vsub.f32 1.5, %v1405_v42 }
 0x5b3   : > { %v1944_v45 = vpop.eup %1943 }
 0x5b4   : > { %v1407_v47 = vmul.f32 %v1942_v36, %v1406_v43  ;;  %v1391_v48 = vmul.f32 %v1944_v45, %v1386_v38  ;;  %v1209_v49 = vpop.xlane.xlu1 %1208 }
 0x5b5   : > { %v1216_v51 = vadd.f32 %v2321_v46, %v1209_v49 }
 0x5b6   : > { %v1408_v52 = vmul.f32 %v1407_v47, %v1389_v34  ;;  %v1392_v53 = vmul.f32 %v1944_v45, %v1391_v48 }
 0x5b7   : > { %v1228_v56 = vmax.f32 %v1216_v51, %v1226_v50 }
 0x5b8   : > { %v1410_v7 = vsel %vm1409_vm7, %v1389_v34, %v1408_v52  ;;  %v1393_v58 = vmul.f32 0.5, %v1392_v53 }
 0x5b9   : > { %v1230_v60 = vsub.f32 %v1216_v51, %v1228_v56  ;;  %v1236_v61 = vsub.f32 %v1226_v50, %v1228_v56  ;;  %v1413_v62 = vsel %vm1411_vm8, %v1412_v55, %v1410_v7  ;;  %v1277_v56 = vmul.f32 %v2192_v33, %v2277_v0 }
 0x5ba   : > { %v1394_v1 = vsub.f32 1.5, %v1393_v58  ;;  %v1415_v2 = vadd.f32 1e-06, %v1413_v62 }
 0x5bb   : > { %v1232_v5 = vmul.f32 1.442695, %v1230_v60  ;;  %v1238_v6 = vmul.f32 1.442695, %v1236_v61  ;;  %v1281_v7 = vsel %vm1132_vm2, %v1277_v56, 0.0 }
 0x5bc   : > { %v1395_v8 = vmul.f32 %v1944_v45, %v1394_v1  ;;  %v1225_v9 = vpop.xlane.xlu1 %1224  ;;  %1945 = vrcp.f32 %v1415_v2 }
 0x5bd   : > { %1947 = vpow2.f32 %v1232_v5  ;;  %v1227_v11 = vadd.f32 %v2321_v46, %v1225_v9  ;;  %v1931_v5 = vld [vmem:[%s2450_s6 + $0x3] ss:$0 sm:$0xff] }
 0x5be   : > { %v1396_v12 = vmul.f32 %v1395_v8, %v1386_v38  ;;  %1949 = vpow2.f32 %v1238_v6 }
 0x5bf   : > { %v1229_v14 = vmax.f32 %v1217_v10, %v1227_v11  ;;  %v1055_v15 = vpop.f32.mrf.mxu1 }
 0x5c0   : > { %v1398_v16 = vsel %vm1397_vm9, %v1386_v38, %v1396_v12 }
 0x5c1   : > { %v1231_v17 = vsub.f32 %v1217_v10, %v1229_v14  ;;  %v1237_v18 = vsub.f32 %v1227_v11, %v1229_v14  ;;  %v1401_v19 = vsel %vm1399_vm10, %v1400_v13, %v1398_v16 }
 0x5c2   : > { %v1946_v21 = vpop.eup %1945  ;;  %v1414_v22 = vadd.f32 1e-06, %v1401_v19 }
 0x5c3   : > { %v1948_v23 = vpop.eup %1947  ;;  %v1234_v24 = vmul.f32 1.442695, %v1231_v17  ;;  %v1240_v28 = vmul.f32 1.442695, %v1237_v18  ;;  %v1419_v29 = vmul.f32 %v1946_v21, %v2277_v0 }
 0x5c4   : > { %v1950_v34 = vpop.eup %1949  ;;  %1951 = vrcp.f32 %v1414_v22  ;;  %v1280_v21 = vpop.xlane.xlu1 %1279 }
 0x5c5   : > { %v1242_v36 = vadd.f32 %v1950_v34, %v1948_v23  ;;  %1953 = vpow2.f32 %v1234_v24  ;;  %v1098_v37 = vpop.f32.mrf.mxu3  ;;  %1469 = vmatpush.msra.mxu1 %v1419_v29 }
 0x5c6   : > { %1955 = vpow2.f32 %v1240_v28 }
 0x5c7   : > { %v1057_v40 = vpop.f32.mrf.mxu1  ;;  %1957 = vrcp.f32 %v1242_v36 }
 0x5c8   : > { %v1060_v38 = vpack.c.bf16 %v1057_v40, %v1055_v15 }
 0x5ca   : > { %v1952_v41 = vpop.eup %1951  ;;  %1073 = vmatpush.bf16.msrb.mxu2 %v1060_v38  ;;  %v1284_v38 = vadd.f32 %v2321_v46, %v1280_v21 }
 0x5cb   : > { %v1954_v42 = vpop.eup %1953  ;;  %v1418_v43 = vmul.f32 %v1952_v41, %v2269_v59 }
 0x5cc   : > { %v1956_v44 = vpop.eup %1955 }
 0x5cd   : > { %v1958_v45 = vpop.eup %1957  ;;  %v1243_v47 = vadd.f32 %v1956_v44, %v1954_v42  ;;  %1842 = vmatmul.msk.bf16.vlgmr.msrb.gmra.mxu2 %vm584_vm1, %v2201_v39  ;;  %v1100_v48 = vpop.f32.mrf.mxu3  ;;  %1470 = vmatpush.msra.mxu1 %v1418_v43 }
 0x5ce   : > { %v1103_v49 = vpack.c.bf16 %v1100_v48, %v1098_v37  ;;  %v1246_v50 = vmul.f32 %v1958_v45, %v1948_v23  ;;  %1852 = vmatmul.msk.f32.vlgmr.msra.gmra.mxu1 %vm584_vm1, %v2310_v31  ;;  %v1260_v52 = vmul.f32 %v1958_v45, %v1950_v34  ;;  %v2338_v31 = vpop.f32.mrf.mxu2  ;;  %v1929_v34 = vld [vmem:[#allocation2] ss:$0 sm:$0xff] }
 0x5cf   : > { %1959 = vrcp.f32 %v1243_v47  ;;  %v1142_v37 = vadd.f32 %v1929_v34, %v2312_v32  ;;  %v1143_v32 = vadd.f32 %v1929_v34, %v2314_v35 }
 0x5d0   : > { %1250 = vperm.xlu0 %1914, %v1246_v50   ;;  %1116 = vmatpush.bf16.msrb.mxu0 %v1103_v49 }
 0x5d3   : > { %1851 = vmatmul.msk.bf16.vlgmr.msrb.gmra.mxu0 %vm584_vm1, %v2201_v39 }
 0x5d5   : > { %v1960_v51 = vpop.eup %1959 }
 0x5d6   : > { %v1247_v53 = vmul.f32 %v1960_v51, %v1954_v42  ;;  %v1261_v55 = vmul.f32 %v1960_v51, %v1956_v44  ;;  %v2340_v60 = vpop.f32.mrf.mxu2 }
 0x5d8   : > { %1264 = vperm.xlu0 %1914, %v1260_v52   ;;  %1255 = vperm.xlu1 %1915, %v1247_v53  }
 0x5e0   : > { %1269 = vperm.xlu1 %1915, %v1261_v55  }
 0x602   : > { %1282 = vadd.xlane.f32.xlu0 %v1281_v7 }
 0x642   : > { %v1251_v58 = vpop.permute.xlu0 %1250 }
 0x643   : > { %v1258_v39 = vmul.f32 %v1251_v58, %v2177_v26 }
 0x64a   : > { %v1265_v61 = vpop.permute.xlu0 %1264  ;;  %v2366_v22 = vpop.permute.xlu1 %1255 }
 0x64b   : > { %v1272_v62 = vmul.f32 %v1265_v61, %v2283_v4  ;;  %v1472_v63 = vpop.f32.mrf.mxu1 }
 0x64c   : > { %v1475_v1 = vmul.f32 %v1472_v63, %v1472_v63 }
 0x64d   : > { %v2344_v2 = vadd.f32 %v1272_v62, %v1258_v39 }
 0x64e   : > { %v1476_v6 = vsel %vm1132_vm2, %v1475_v1, 0.0 }
 0x64f   : > { %1477 = vadd.xlane.f32.xlu2 %v1476_v6 }
 0x650   : > { %v1075_v8 = vpop.f32.mrf.mxu2 }
 0x651   : > { %v2350_v9 = vadd.f32 %v1931_v5, %v1075_v8 }
 0x652   : > { %v2368_v23 = vpop.permute.xlu1 %1269 }
 0x653   : > { %v1144_v10 = vmul.f32 %v2267_v57, %v2350_v9  ;;  %v1286_v11 = vmul.f32 %v2192_v33, %v2350_v9 }
 0x655   : > { %v1146_v12 = vsel %vm1132_vm2, %v1144_v10, 0.0  ;;  %v1288_v13 = vsel %vm1132_vm2, %v1286_v11, 0.0 }
 0x656   : > { %1147 = vadd.xlane.f32.xlu0 %v1146_v12  ;;  %1289 = vadd.xlane.f32.xlu1 %v1288_v13 }
 0x658   : > { %v1077_v14 = vpop.f32.mrf.mxu2 }
 0x659   : > { %v2358_v15 = vadd.f32 %v1931_v5, %v1077_v14 }
 0x65b   : > { %v1287_v16 = vmul.f32 %v2192_v33, %v2358_v15  ;;  %v1145_v17 = vmul.f32 %v2267_v57, %v2358_v15 }
 0x65d   : > { %v1291_v18 = vsel %vm1132_vm2, %v1287_v16, 0.0  ;;  %v1149_v19 = vsel %vm1132_vm2, %v1145_v17, 0.0 }
 0x65e   : > { %1292 = vadd.xlane.f32.xlu0 %v1291_v18  ;;  %1150 = vadd.xlane.f32.xlu1 %v1149_v19 }
 0x675   : > { %v1283_v24 = vpop.xlane.xlu0 %1282 }
 0x676   : > { %v1285_v39 = vadd.f32 %v2321_v46, %v1283_v24 }
 0x6c2   : > { %v1478_v28 = vpop.xlane.xlu2 %1477 }
 0x6c3   : > { %v1479_v29 = vrot.slane %v1478_v28, 4 }
 0x6c5   : > { %v1480_v36 = vadd.f32 %v1479_v29, %v1478_v28 }
 0x6c7   : > { %v1481_v33 = vrot.slane %v1480_v36, 2 }
 0x6c9   : > { %v1148_v57 = vpop.xlane.xlu0 %1147  ;;  %v1290_v40 = vpop.xlane.xlu1 %1289  ;;  %v1482_v43 = vadd.f32 %v1481_v33, %v1480_v36 }
 0x6ca   : > { %v1152_v41 = vadd.f32 %v1929_v34, %v1148_v57  ;;  %v1294_v42 = vadd.f32 %v2321_v46, %v1290_v40 }
 0x6cb   : > { %v1483_v47 = vrot.slane %v1482_v43, 1 }
 0x6cc   : > { %v1154_v44 = vmax.f32 %v1142_v37, %v1152_v41  ;;  %v1296_v45 = vmax.f32 %v1284_v38, %v1294_v42 }
 0x6cd   : > { %v1484_v52 = vadd.f32 %v1483_v47, %v1482_v43 }
 0x6ce   : > { %v1156_v48 = vsub.f32 %v1142_v37, %v1154_v44  ;;  %v1162_v49 = vsub.f32 %v1152_v41, %v1154_v44  ;;  %v1298_v50 = vsub.f32 %v1284_v38, %v1296_v45  ;;  %v1304_v51 = vsub.f32 %v1294_v42, %v1296_v45 }
 0x6cf   : > { %1878 = vpush %v1484_v52  ;;  %v1925_v52 = vld [vmem:[%s2452_s8 + $0x1] ss:$0 sm:$0xff] }
 0x6d0   : > { %v1158_v53 = vmul.f32 1.442695, %v1156_v48  ;;  %v1164_v55 = vmul.f32 1.442695, %v1162_v49  ;;  %v1300_v56 = vmul.f32 1.442695, %v1298_v50 }
 0x6d1   : > { %v1306_v7 = vmul.f32 1.442695, %v1304_v51  ;;  %v1293_v58 = vpop.xlane.xlu0 %1292  ;;  %v1151_v61 = vpop.xlane.xlu1 %1150  ;;  %v1922_v48 = vld [vmem:[%s2452_s8] ss:$0 sm:$0xff] }
 0x6d2   : > { %1961 = vpow2.f32 %v1158_v53  ;;  %v1295_v62 = vadd.f32 %v2321_v46, %v1293_v58  ;;  %v1153_v63 = vadd.f32 %v1929_v34, %v1151_v61  ;;  %v684_v49 = vadd.f32 %v1922_v48, %v2226_v25  ;;  %v1932_v25 = vld [vmem:[%s2452_s8 + $0x3] ss:$0 sm:$0xff] }
 0x6d3   : > { %1963 = vpow2.f32 %v1164_v55  ;;  %v835_v53 = vadd.f32 %v1925_v52, %v2253_v54  ;;  %v1118_v55 = vpop.f32.mrf.mxu0  ;;  %v833_v54 = vadd.f32 %v1925_v52, %v2251_v3 }
 0x6d4   : > { %1965 = vpow2.f32 %v1300_v56  ;;  %v1297_v1 = vmax.f32 %v1285_v39, %v1295_v62  ;;  %v1155_v5 = vmax.f32 %v1143_v32, %v1153_v63  ;;  %v1119_v56 = vadd.f32 %v1932_v25, %v1118_v55 }
 0x6d5   : > { %1967 = vpow2.f32 %v1306_v7 }
 0x6d6   : > { %v1299_v6 = vsub.f32 %v1285_v39, %v1297_v1  ;;  %v1305_v8 = vsub.f32 %v1295_v62, %v1297_v1  ;;  %v1157_v10 = vsub.f32 %v1143_v32, %v1155_v5  ;;  %v1163_v11 = vsub.f32 %v1153_v63, %v1155_v5  ;;  %v1930_v32 = vld [vmem:[%s2452_s8 + $0x2] ss:$0 sm:$0xff] }
 0x6d7   : > { %v978_v7 = vadd.f32 %v1930_v32, %v2340_v60  ;;  %v976_v58 = vadd.f32 %v1930_v32, %v2338_v31  ;;  %v1273_v31 = vmul.f32 %v2368_v23, %v2299_v20 }
 0x6d8   : > { %v1962_v35 = vpop.eup %1961  ;;  %v1302_v12 = vmul.f32 1.442695, %v1299_v6  ;;  %v1308_v13 = vmul.f32 1.442695, %v1305_v8  ;;  %v1160_v14 = vmul.f32 1.442695, %v1157_v10  ;;  %v1259_v6 = vmul.f32 %v2366_v22, %v2182_v30 }
 0x6d9   : > { %v1964_v16 = vpop.eup %1963  ;;  %v1166_v17 = vmul.f32 1.442695, %v1163_v11 }
 0x6da   : > { %v1966_v18 = vpop.eup %1965  ;;  %v1168_v19 = vadd.f32 %v1964_v16, %v1962_v35  ;;  %1969 = vpow2.f32 %v1302_v12  ;;  %v1275_v10 = vadd.f32 %v1273_v31, %v1259_v6 }
 0x6db   : > { %v1968_v46 = vpop.eup %1967  ;;  %1971 = vpow2.f32 %v1308_v13  ;;  %v1120_v61 = vpop.f32.mrf.mxu0 }
 0x6dc   : > { %v1310_v21 = vadd.f32 %v1968_v46, %v1966_v18  ;;  %1973 = vpow2.f32 %v1160_v14  ;;  %v1121_v39 = vadd.f32 %v1932_v25, %v1120_v61 }
 0x6dd   : > { %1975 = vpow2.f32 %v1166_v17 }
 0x6de   : > { %1977 = vrcp.f32 %v1168_v19 }
 0x6df   : > { %1979 = vrcp.f32 %v1310_v21 }
 0x6e0   : > { %v1970_v24 = vpop.eup %1969 }
 0x6e1   : > { %v1972_v28 = vpop.eup %1971 }
 0x6e2   : > { %v1974_v29 = vpop.eup %1973  ;;  %v1311_v34 = vadd.f32 %v1972_v28, %v1970_v24 }
 0x6e3   : > { %v1976_v36 = vpop.eup %1975 }
 0x6e4   : > { %v1978_v33 = vpop.eup %1977  ;;  %v1169_v37 = vadd.f32 %v1976_v36, %v1974_v29  ;;  %1981 = vrcp.f32 %v1311_v34 }
 0x6e5   : > { %v1980_v57 = vpop.eup %1979  ;;  %v1172_v40 = vmul.f32 %v1978_v33, %v1962_v35  ;;  %v1186_v38 = vmul.f32 %v1978_v33, %v1964_v16 }
 0x6e6   : > { %v1314_v41 = vmul.f32 %v1980_v57, %v1966_v18  ;;  %1983 = vrcp.f32 %v1169_v37  ;;  %v1328_v45 = vmul.f32 %v1980_v57, %v1968_v46 }
 0x6e7   : > { %1176 = vperm.xlu2 %1916, %v1172_v40   ;;  %1190 = vperm.xlu1 %1915, %v1186_v38  }
 0x6e8   : > { %1318 = vperm.xlu0 %1914, %v1314_v41  }
 0x6ea   : > { %v1982_v42 = vpop.eup %1981 }
 0x6eb   : > { %v1329_v43 = vmul.f32 %v1982_v42, %v1972_v28  ;;  %v1315_v51 = vmul.f32 %v1982_v42, %v1970_v24 }
 0x6ec   : > { %v1984_v44 = vpop.eup %1983 }
 0x6ed   : > { %v1173_v47 = vmul.f32 %v1984_v44, %v1974_v29  ;;  %v1187_v50 = vmul.f32 %v1984_v44, %v1976_v36 }
 0x6ef   : > { %1337 = vperm.xlu2 %1916, %v1329_v43   ;;  %1332 = vperm.xlu1 %1915, %v1328_v45  }
 0x6f0   : > { %1181 = vperm.xlu0 %1914, %v1173_v47  }
 0x6f7   : > { %1521 = vrot.lane.b32.xlu2 %v684_v49, %s2033_s10  ;;  %1195 = vperm.xlu1 %1915, %v1187_v50  }
 0x6f8   : > { %1323 = vperm.xlu0 %1914, %v1315_v51  }
 0x6ff   : > { %1531 = vrot.lane.b32.xlu2 %v835_v53, %s2034_s18  ;;  %1499 = vrot.lane.b32.xlu1 %v2299_v20, %s2035_s16 }
 0x700   : > { %1497 = vrot.lane.b32.xlu0 %v2283_v4, %s2035_s16  ;;  %v686_v4 = vadd.f32 %v1922_v48, %v2228_v27  ;;  %s527_s16 = scalar_lea.vmem %s2457_s13, %s1858_s24 }
 0x707   : > { %1507 = vrot.lane.b32.xlu1 %v2277_v0, %s2036_s20  ;;  %1545 = vrot.lane.b32.xlu2 %v1119_v56, %s2037_s21 }
 0x708   : > { %1505 = vrot.lane.b32.xlu0 %v2269_v59, %s2036_s20 }
 0x70f   : > { %1515 = vrot.lane.b32.xlu1 %v2358_v15, %s2038_s22 }
 0x710   : > { %1513 = vrot.lane.b32.xlu0 %v2350_v9, %s2038_s22 }
 0x717   : > { %1529 = vrot.lane.b32.xlu1 %v833_v54, %s2034_s18 }
 0x718   : > { %1523 = vrot.lane.b32.xlu0 %v686_v4, %s2033_s10  ;;  %s1879_s10 = spop %1878 }
 0x719   : > { %v1486_v51 = vstv %s1879_s10 }
 0x71f   : > { %1539 = vrot.lane.b32.xlu1 %v978_v7, %s2039_s28 }
 0x720   : > { %1537 = vrot.lane.b32.xlu0 %v976_v58, %s2039_s28 }
 0x728   : > { %1547 = vrot.lane.b32.xlu0 %v1121_v39, %s2037_s21 }
 0x730   : > { %1561 = vrot.lane.b32.xlu0 %v2344_v2, %s2040_s26 }
 0x741   : > { %v1177_v27 = vpop.permute.xlu2 %1176 }
 0x742   : > { %v1184_v62 = vmul.f32 %v1177_v27, %v2269_v59 }
 0x749   : > { %v1338_v2 = vpop.permute.xlu2 %1337 }
 0x74a   : > { %v1341_v14 = vmul.f32 %v1338_v2, %v2358_v15 }
 0x751   : > { %v1522_v29 = vpop.permute.xlu2 %1521 }
 0x759   : > { %v1191_v3 = vpop.permute.xlu1 %1190  ;;  %v1532_v36 = vpop.permute.xlu2 %1531 }
 0x75a   : > { %v1319_v63 = vpop.permute.xlu0 %1318  ;;  %v1198_v1 = vmul.f32 %v1191_v3, %v2350_v9 }
 0x75b   : > { %v1326_v23 = vmul.f32 %v1319_v63, %v2269_v59 }
 0x75c   : > { %v1200_v5 = vadd.f32 %v1198_v1, %v1184_v62 }
 0x75e   : > { %1553 = vrot.lane.b32.xlu1 %v1200_v5, %s2041_s29 }
 0x761   : > { %v1333_v60 = vpop.permute.xlu1 %1332 }
 0x762   : > { %v1182_v8 = vpop.permute.xlu0 %1181  ;;  %v1340_v22 = vmul.f32 %v1333_v60, %v2350_v9  ;;  %v1546_v9 = vpop.permute.xlu2 %1545 }
 0x763   : > { %v1185_v35 = vmul.f32 %v1182_v8, %v2277_v0 }
 0x764   : > { %v1342_v18 = vadd.f32 %v1340_v22, %v1326_v23 }
 0x766   : > { %1563 = vrot.lane.b32.xlu1 %v1275_v10, %s2040_s26 }
 0x769   : > { %v1196_v11 = vpop.permute.xlu1 %1195 }
 0x76a   : > { %v1324_v12 = vpop.permute.xlu0 %1323  ;;  %v1199_v13 = vmul.f32 %v1196_v11, %v2358_v15 }
 0x76b   : > { %v1327_v16 = vmul.f32 %v1324_v12, %v2277_v0  ;;  %v2043_v0 = vmov 64.0  }
 0x76c   : > { %v1201_v17 = vadd.f32 %v1199_v13, %v1185_v35  ;;  %1985 = vrcp.f32 %v2043_v0 }
 0x76d   : > { %v1343_v20 = vadd.f32 %v1341_v14, %v1327_v16 }
 0x76e   : > { %1555 = vrot.lane.b32.xlu2 %v1201_v17, %s2041_s29 }
 0x76f   : > { %1571 = vrot.lane.b32.xlu0 %v1343_v20, %s2042_s30 }
 0x771   : > { %v1500_v21 = vpop.permute.xlu1 %1499 }
 0x772   : > { %v1498_v19 = vpop.permute.xlu0 %1497  ;;  %v1986_v33 = vpop.eup %1985  ;;  %v1576_v61 = vsel %vm1132_vm2, %v2182_v30, %v1500_v21 }
 0x773   : > { %v1488_v40 = vmul.f32 64.0, %v1986_v33  ;;  %v1575_v59 = vsel %vm1132_vm2, %v2177_v26, %v1498_v19  ;;  %vm1492_vm14 = vweird.f32 %v1986_v33 }
 0x775   : > { %v1489_v38 = vsub.f32 1.0, %v1488_v40 }
 0x776   : > { %1569 = vrot.lane.b32.xlu2 %v1342_v18, %s2042_s30 }
 0x777   : > { %v1490_v41 = vmul.f32 %v1986_v33, %v1489_v38 }
 0x779   : > { %v1508_v28 = vpop.permute.xlu1 %1507  ;;  %v1491_v48 = vadd.f32 %v1986_v33, %v1490_v41 }
 0x77a   : > { %v1506_v46 = vpop.permute.xlu0 %1505  ;;  %v1578_v39 = vsel %vm584_vm1, %v1576_v61, %v1508_v28 }
 0x77b   : > { %v1577_v42 = vsel %vm584_vm1, %v1575_v59, %v1506_v46  ;;  %v1493_v52 = vsel %vm1492_vm14, %v1986_v33, %v1491_v48 }
 0x77c   : > { %v1494_v54 = vmul.f32 %v1493_v52, %v1486_v51 }
 0x781   : > { %v1516_v34 = vpop.permute.xlu1 %1515 }
 0x782   : > { %v1514_v24 = vpop.permute.xlu0 %1513  ;;  %v1581_v27 = vsel %vm1579_vm11, %v1578_v39, %v1516_v34 }
 0x783   : > { %v1580_v44 = vsel %vm1579_vm11, %v1577_v42, %v1514_v24 }
 0x784   : > { %v1582_v49 = vsel %vm556_vm0, %v1580_v44, %v1522_v29 }
 0x789   : > { %v1530_v57 = vpop.permute.xlu1 %1529 }
 0x78a   : > { %v1524_v15 = vpop.permute.xlu0 %1523  ;;  %v1585_v50 = vsel %vm1584_vm12, %v1582_v49, %v1530_v57 }
 0x78b   : > { %v1583_v3 = vsel %vm556_vm0, %v1581_v27, %v1524_v15 }
 0x78c   : > { %v1586_v62 = vsel %vm1584_vm12, %v1583_v3, %v1532_v36 }
 0x791   : > { %v1540_v45 = vpop.permute.xlu1 %1539 }
 0x792   : > { %v1538_v37 = vpop.permute.xlu0 %1537  ;;  %v1589_v63 = vsel %vm1587_vm13, %v1586_v62, %v1540_v45 }
 0x793   : > { %v1588_v26 = vsel %vm1587_vm13, %v1585_v50, %v1538_v37 }
 0x794   : > { %v1591_v53 = vsel %vm1590_vm15, %v1588_v26, %v1546_v9 }
 0x79a   : > { %v1548_v43 = vpop.permute.xlu0 %1547 }
 0x79b   : > { %v1592_v5 = vsel %vm1590_vm15, %v1589_v63, %v1548_v43 }
 0x7a2   : > { %v1562_v55 = vpop.permute.xlu0 %1561 }
 0x7c8   : > { %v1556_v47 = vpop.permute.xlu2 %1555 }
 0x7c9   : > { %v1595_v31 = vsel %vm1593_vm4, %v1592_v5, %v1556_v47 }
 0x7d0   : > { %v1554_v25 = vpop.permute.xlu1 %1553  ;;  %v1570_v4 = vpop.permute.xlu2 %1569 }
 0x7d1   : > { %v1594_v56 = vsel %vm1593_vm4, %v1591_v53, %v1554_v25 }
 0x7d2   : > { %v1597_v32 = vsel %vm1596_vm3, %v1594_v56, %v1562_v55 }
 0x7d3   : > { %v1600_v7 = vsel %vm1599_vm5, %v1597_v32, %v1570_v4 }
 0x7d4   : > { %v1603_v58 = vsel %vm1602_vm6, %v1600_v7, %v1494_v54 }
 0x7d5   : > { %1605 = vst [vmem:[%s527_s16] sm:$0xff] %v1603_v58 }
 0x7d8   : > { %v1564_v1 = vpop.permute.xlu1 %1563 }
 0x7d9   : > { %v1598_v60 = vsel %vm1596_vm3, %v1595_v31, %v1564_v1 }
 0x7e1   : > { %v1572_v6 = vpop.permute.xlu0 %1571 }
 0x7e2   : > { %v1601_v30 = vsel %vm1599_vm5, %v1598_v60, %v1572_v6 }
 0x7e3   : > { %v1604_v8 = vsel %vm1602_vm6, %v1601_v30, %v1494_v54 }
 0x7e4   : > { %1606 = vst [vmem:[%s527_s16 + $0x8] sm:$0xff] %v1604_v8 }
 0x7e5 PF: > { %s26_s27 = sadd.s32 1, %s2027_s27  }
 0x7e6   : > { %p23_p7 = scmp.ge.s32.totalorder %s26_s27, 4  }
 0x7e8   :  { %25 = sbr.rel (!%p23_p7) target bundleno = 4 (0x4), region = 137 }
 0x7ed   :  { %1628 = vsyncpa [#allocation4], 1 }
 0x7ee   :  { %1630 = vsyncpa [#allocation4 + $0x1], 1 }

</bundles_post_ra>
